<compile_context>
chip_gen: v7x
topology: tpu7x:2x2x1
jax: 0.10.0
libtpu: 0.0.40
codegen_flags: <defaults>
</compile_context>

<pallas_src>
import functools

import jax
import jax.numpy as jnp
from jax.experimental import pallas as pl
from jax.experimental.pallas import tpu as pltpu

EXPANSION = 4   # Bottleneck.expansion
LANE = 128


def _round_up(x, m):
    return (x + m - 1) // m * m


# ----------------------------------------------------------------------------
# Fused conv + BN-shift (+ residual) (+ ReLU) kernel.
#
# One grid step = one image.  x_ref holds the whole (spatially padded) image,
# w_ref the full folded weight (k*k, C, N), b_ref the per-channel shift (1, N).
# The k*k taps are accumulated in f32 on the MXU; the epilogue fuses the shift,
# optional residual and ReLU and stores the lane-dense bf16 output block.
# ----------------------------------------------------------------------------
def _conv_bn_kernel(*refs, ksize, stride, relu, has_res):
    if has_res:
        x_ref, w_ref, b_ref, r_ref, o_ref = refs
    else:
        x_ref, w_ref, b_ref, o_ref = refs
        r_ref = None

    Ho, Wo, N = o_ref.shape
    C = w_ref.shape[1]

    acc = None
    for dh in range(ksize):
        for dw in range(ksize):
            if stride == 1:
                if ksize == 1:
                    xs = x_ref[...]                                   # (Ho, Wo, C)
                else:
                    xs = x_ref[pl.ds(dh, Ho), pl.ds(dw, Wo), :]       # shifted window
            else:
                # stride 2: x_ref is the polyphase view (Hp/2, 2, Wp/2, 2C).
                # Input pixel (2*ho+dh, 2*wo+dw, c) lives at
                #   [ho + dh//2, dh%2, wo + dw//2, (dw%2)*C + c],
                # so the strided window becomes contiguous slices plus a
                # 128-aligned lane slice — no strided loads needed.
                xs = x_ref[pl.ds(dh // 2, Ho), dh % 2,
                           pl.ds(dw // 2, Wo), pl.ds((dw % 2) * C, C)]
            contrib = jnp.dot(xs.reshape(Ho * Wo, C), w_ref[dh * ksize + dw],
                              preferred_element_type=jnp.float32)
            acc = contrib if acc is None else acc + contrib

    y = (acc + b_ref[...]).reshape(Ho, Wo, N)
    if r_ref is not None:
        y = y + r_ref[...].astype(jnp.float32)
    if relu:
        y = jnp.maximum(y, 0.0)
    o_ref[...] = y.astype(o_ref.dtype)


# ----------------------------------------------------------------------------
# Wrapper: one pallas_call per conv+BN(+res)(+ReLU) stage.
# ----------------------------------------------------------------------------
def conv_bn(x, p, stride, relu=True, residual=None):
    assert stride in (1, 2)
    B, H, W, C = x.shape
    k, pad = p['k'], p['pad']
    w = p['w']                                   # (k*k, C, N) bf16, BN scale folded in
    N = w.shape[-1]
    shift = p['shift'].reshape(1, N).astype(jnp.float32)

    Ho = (H + 2 * pad - k) // stride + 1
    Wo = (W + 2 * pad - k) // stride + 1
    Hp, Wp = H + 2 * pad, W + 2 * pad

    if stride == 2:
        # Conv zero-pad + round spatial dims up to even, then take the *free*
        # polyphase view (B, Hp/2, 2, Wp/2, 2C) consumed by the kernel.
        Hp, Wp = _round_up(Hp, 2), _round_up(Wp, 2)
        widths = ((0, 0), (pad, Hp - H - pad), (pad, Wp - W - pad), (0, 0))
        if any(lo or hi for lo, hi in widths):
            x = jnp.pad(x, widths)
        x = x.reshape(B, Hp // 2, 2, Wp // 2, 2 * C)
        x_spec = pl.BlockSpec((None, Hp // 2, 2, Wp // 2, 2 * C),
                              lambda b: (b, 0, 0, 0, 0))
    else:
        if pad:
            # TODO(synk): fuse this zero-pad into the producing kernel's epilogue.
            x = jnp.pad(x, ((0, 0), (pad, pad), (pad, pad), (0, 0)))
        x_spec = pl.BlockSpec((None, Hp, Wp, C), lambda b: (b, 0, 0, 0))

    w_spec = pl.BlockSpec((k * k, C, N), lambda b: (0, 0, 0))      # VMEM-resident
    b_spec = pl.BlockSpec((1, N), lambda b: (0, 0))
    o_spec = pl.BlockSpec((None, Ho, Wo, N), lambda b: (b, 0, 0, 0))

    in_specs = [x_spec, w_spec, b_spec]
    args = [x, w, shift]
    if residual is not None:
        in_specs.append(pl.BlockSpec((None, Ho, Wo, N), lambda b: (b, 0, 0, 0)))
        args.append(residual)

    # VMEM budget: double-buffered streaming blocks + resident weight + f32 acc,
    # clamped to 48 MiB so the same config also fits v7x's 64 MiB VMEM.
    xb = Hp * Wp * C * 2
    ob = Ho * Wo * N * 2
    rb = ob if residual is not None else 0
    wb = k * k * C * N * 2
    accb = Ho * Wo * N * 4
    est = 2 * (xb + ob + rb + wb) + accb + 2 * N * 4
    vmem_limit = int(min(max(2 * est, 32 * 1024 * 1024), 48 * 1024 * 1024))

    kern = functools.partial(_conv_bn_kernel, ksize=k, stride=stride, relu=relu,
                             has_res=residual is not None)
    return pl.pallas_call(
        kern,
        out_shape=jax.ShapeDtypeStruct((B, Ho, Wo, N), jnp.bfloat16),
        grid=(B,),
        in_specs=in_specs,
        out_specs=o_spec,
        compiler_params=pltpu.CompilerParams(
            dimension_semantics=("parallel",),
            vmem_limit_bytes=vmem_limit),
    )(*args)


# ----------------------------------------------------------------------------
# Parameter construction (inference-mode BN folded into the conv weights).
# ----------------------------------------------------------------------------
def make_conv_bn(key, cin, cout, k):
    k1, k2, k3, k4, k5 = jax.random.split(key, 5)
    w = jax.random.normal(k1, (k, k, cin, cout), jnp.float32) / jnp.sqrt(k * k * cin)
    gamma = 1.0 + 0.1 * jax.random.normal(k2, (cout,), jnp.float32)
    beta = 0.1 * jax.random.normal(k3, (cout,), jnp.float32)
    rmean = 0.1 * jax.random.normal(k4, (cout,), jnp.float32)
    rvar = 1.0 + 0.1 * jax.random.uniform(k5, (cout,), jnp.float32)
    eps = 1e-5
    scale = gamma * jax.lax.rsqrt(rvar + eps)
    shift = beta - rmean * scale

    cin_p, cout_p = _round_up(cin, LANE), _round_up(cout, LANE)
    w_folded = w * scale[None, None, None, :]        # fold BN scale into the weights
    w_p = jnp.zeros((k, k, cin_p, cout_p), jnp.float32).at[:, :, :cin, :cout].set(w_folded)
    shift_p = jnp.zeros((cout_p,), jnp.float32).at[:cout].set(shift)
    return {'w': w_p.reshape(k * k, cin_p, cout_p).astype(jnp.bfloat16),
            'k': k, 'pad': (k - 1) // 2, 'shift': shift_p}


def make_bottleneck(key, in_planes, planes, stride):
    keys = jax.random.split(key, 4)
    p = {'conv1': make_conv_bn(keys[0], in_planes, planes, 1),
         'conv2': make_conv_bn(keys[1], planes, planes, 3),
         'conv3': make_conv_bn(keys[2], planes, EXPANSION * planes, 1),
         'stride': stride,
         'out_channels': EXPANSION * planes,
         'shortcut': None}
    if stride != 1 or in_planes != EXPANSION * planes:
        p['shortcut'] = make_conv_bn(keys[3], in_planes, EXPANSION * planes, 1)
    return p


def bottleneck_forward(x_nchw, params):
    # NCHW f32 -> padded NHWC bf16 once at the block boundary.  (When stacking
    # blocks, keep activations in padded NHWC bf16 and skip these conversions.)
    x = jnp.transpose(x_nchw, (0, 2, 3, 1)).astype(jnp.bfloat16)
    cin = x.shape[-1]
    cin_p = _round_up(cin, LANE)
    if cin_p != cin:
        x = jnp.pad(x, ((0, 0), (0, 0), (0, 0), (0, cin_p - cin)))
    out = conv_bn(x, params['conv1'], 1, relu=True)                    # relu(bn1(conv1(x)))
    out = conv_bn(out, params['conv2'], params['stride'], relu=True)   # relu(bn2(conv2(out)))
    if params['shortcut'] is not None:
        sc = conv_bn(x, params['shortcut'], params['stride'], relu=False)  # bn(conv1x1(x))
    else:
        sc = x
    # relu(bn3(conv3(out)) + shortcut), residual add fused into the kernel epilogue
    out = conv_bn(out, params['conv3'], 1, relu=True, residual=sc)
    out = out[..., :params['out_channels']].astype(jnp.float32)
    return jnp.transpose(out, (0, 3, 1, 2))                            # back to NCHW


# ----------------------------------------------------------------------------
# Pure-JAX reference (same bf16 rounding points) for a correctness check.
# ----------------------------------------------------------------------------
def _ref_conv_bn(x, p, stride, relu=True, residual=None):
    kk, cin_p, cout_p = p['w'].shape
    k = p['k']
    w = p['w'].astype(jnp.float32).reshape(k, k, cin_p, cout_p)
    y = jax.lax.conv_general_dilated(
        x.astype(jnp.float32), w, window_strides=(stride, stride),
        padding=[(p['pad'], p['pad'])] * 2,
        dimension_numbers=('NHWC', 'HWIO', 'NHWC'))
    y = y + p['shift'].reshape(1, 1, 1, -1)
    if residual is not None:
        y = y + residual.astype(jnp.float32)
    if relu:
        y = jnp.maximum(y, 0.0)
    return y.astype(jnp.bfloat16)


def bottleneck_reference(x_nchw, params):
    x = jnp.transpose(x_nchw, (0, 2, 3, 1)).astype(jnp.bfloat16)
    cin = x.shape[-1]
    cin_p = _round_up(cin, LANE)
    if cin_p != cin:
        x = jnp.pad(x, ((0, 0), (0, 0), (0, 0), (0, cin_p - cin)))
    out = _ref_conv_bn(x, params['conv1'], 1, relu=True)
    out = _ref_conv_bn(out, params['conv2'], params['stride'], relu=True)
    sc = (_ref_conv_bn(x, params['shortcut'], params['stride'], relu=False)
          if params['shortcut'] is not None else x)
    out = _ref_conv_bn(out, params['conv3'], 1, relu=True, residual=sc)
    out = out[..., :params['out_channels']].astype(jnp.float32)
    return jnp.transpose(out, (0, 3, 1, 2))


if __name__ == "__main__":
    key = jax.random.PRNGKey(0)

    # (in_planes, planes, stride): projection-shortcut strided block exercises the
    # polyphase stride-2 3x3 and 1x1 paths; the second config exercises the
    # identity-shortcut / stride-1 3x3 path.
    configs = [(32, 16, 2), (64, 16, 1)]
    B, H, W = 2, 16, 16

    for idx, (in_planes, planes, stride) in enumerate(configs):
        pkey, xkey = jax.random.split(jax.random.fold_in(key, idx))
        params = make_bottleneck(pkey, in_planes, planes, stride)
        x = jax.random.normal(xkey, (B, in_planes, H, W), jnp.float32)   # NCHW, like PyTorch

        fwd = jax.jit(lambda inp, p=params: bottleneck_forward(inp, p))
        out = fwd(x)
        jax.block_until_ready(out)

        Ho = (H + 2 - 3) // stride + 1
        assert out.shape == (B, EXPANSION * planes, Ho, Ho), out.shape
        assert bool(jnp.all(jnp.isfinite(out)))

        ref = jax.jit(lambda inp, p=params: bottleneck_reference(inp, p))(x)
        jax.block_until_ready(ref)
        err = float(jnp.max(jnp.abs(out - ref)))
        assert bool(jnp.allclose(out, ref, atol=2e-2, rtol=2e-2)), err

    print("KERNEL_OK")
</pallas_src>

<mosaic_0001>
module attributes {stable_mosaic.version = 11 : i64} {
  func.func @_conv_bn_kernel(%arg0: i32, %arg1: memref<1x8x2x8x256xbf16, #tpu.memory_space<vmem>>, %arg2: memref<1x128x128xbf16, #tpu.memory_space<vmem>>, %arg3: memref<1x128xf32, #tpu.memory_space<vmem>>, %arg4: memref<1x8x8x128xbf16, #tpu.memory_space<vmem>>) attributes {dimension_semantics = [#tpu.dimension_semantics<parallel>], iteration_bounds = array<i64: 2>, scalar_prefetch = 0 : i64, scratch_operands = 0 : i64, tpu.core_type = #tpu.core_type<tc>, window_params = [{transform_indices = @transform_0, window_bounds = array<i64: 1, 8, 2, 8, 256>}, {pipeline_mode = #tpu.pipeline_mode<synchronous>, transform_indices = @transform_1, window_bounds = array<i64: 1, 128, 128>}, {pipeline_mode = #tpu.pipeline_mode<synchronous>, transform_indices = @transform_2, window_bounds = array<i64: 1, 128>}, {transform_indices = @transform_3, window_bounds = array<i64: 1, 8, 8, 128>}]} {
    %c0 = arith.constant 0 : index
    %c0_0 = arith.constant 0 : index
    %c0_1 = arith.constant 0 : index
    %c0_2 = arith.constant 0 : index
    %c0_3 = arith.constant 0 : index
    %0 = vector.load %arg1[%c0, %c0_0, %c0_1, %c0_2, %c0_3] : memref<1x8x2x8x256xbf16, #tpu.memory_space<vmem>>, vector<1x8x1x8x128xbf16>
    %1 = vector.shape_cast %0 : vector<1x8x1x8x128xbf16> to vector<8x8x128xbf16>
    %2 = vector.shape_cast %1 : vector<8x8x128xbf16> to vector<64x128xbf16>
    %c0_4 = arith.constant 0 : index
    %c0_5 = arith.constant 0 : index
    %c0_6 = arith.constant 0 : index
    %3 = vector.load %arg2[%c0_4, %c0_5, %c0_6] : memref<1x128x128xbf16, #tpu.memory_space<vmem>>, vector<1x128x128xbf16>
    %4 = vector.shape_cast %3 : vector<1x128x128xbf16> to vector<128x128xbf16>
    %cst = arith.constant dense<0.000000e+00> : vector<64x128xf32>
    %5 = tpu.matmul %2, %4, %cst {dimension_numbers = #tpu.dot_dimension_numbers<[1], [0], [0], [1], [0, 0, 1, 1], [], []>} : vector<64x128xbf16>, vector<128x128xbf16>, vector<64x128xf32> -> vector<64x128xf32>
    %c0_7 = arith.constant 0 : index
    %c0_8 = arith.constant 0 : index
    %6 = vector.load %arg3[%c0_7, %c0_8] : memref<1x128xf32, #tpu.memory_space<vmem>>, vector<1x128xf32>
    %7 = vector.broadcast %6 : vector<1x128xf32> to vector<64x128xf32>
    %8 = arith.addf %5, %7 : vector<64x128xf32>
    %9 = vector.shape_cast %8 : vector<64x128xf32> to vector<8x8x128xf32>
    %10 = arith.truncf %9 : vector<8x8x128xf32> to vector<8x8x128xbf16>
    %c0_9 = arith.constant 0 : index
    %c0_10 = arith.constant 0 : index
    %c0_11 = arith.constant 0 : index
    %c0_12 = arith.constant 0 : index
    %11 = vector.load %arg4[%c0_9, %c0_10, %c0_11, %c0_12] : memref<1x8x8x128xbf16, #tpu.memory_space<vmem>>, vector<1x8x8x128xbf16>
    %12 = vector.shape_cast %11 : vector<1x8x8x128xbf16> to vector<8x8x128xbf16>
    %13 = vector.shape_cast %10 : vector<8x8x128xbf16> to vector<1x8x8x128xbf16>
    tpu.vector_store %arg4[%c0_9, %c0_10, %c0_11, %c0_12], %13 {strides = array<i32>} : memref<1x8x8x128xbf16, #tpu.memory_space<vmem>>, vector<1x8x8x128xbf16>,
    return
  }
  func.func @transform_0(%arg0: i32) -> (i32, i32, i32, i32, i32) {
    %c0_i32 = arith.constant 0 : i32
    %c0_i32_0 = arith.constant 0 : i32
    %c0_i32_1 = arith.constant 0 : i32
    %c0_i32_2 = arith.constant 0 : i32
    %c0_i32_3 = arith.constant 0 : i32
    return %arg0, %c0_i32, %c0_i32_0, %c0_i32_1, %c0_i32_2 : i32, i32, i32, i32, i32
  }
  func.func @transform_1(%arg0: i32) -> (i32, i32, i32) {
    %c0_i32 = arith.constant 0 : i32
    %c0_i32_0 = arith.constant 0 : i32
    %c0_i32_1 = arith.constant 0 : i32
    %c0_i32_2 = arith.constant 0 : i32
    return %c0_i32, %c0_i32_0, %c0_i32_1 : i32, i32, i32
  }
  func.func @transform_2(%arg0: i32) -> (i32, i32) {
    %c0_i32 = arith.constant 0 : i32
    %c0_i32_0 = arith.constant 0 : i32
    %c0_i32_1 = arith.constant 0 : i32
    return %c0_i32, %c0_i32_0 : i32, i32
  }
  func.func @transform_3(%arg0: i32) -> (i32, i32, i32, i32) {
    %c0_i32 = arith.constant 0 : i32
    %c0_i32_0 = arith.constant 0 : i32
    %c0_i32_1 = arith.constant 0 : i32
    %c0_i32_2 = arith.constant 0 : i32
    return %arg0, %c0_i32, %c0_i32_0, %c0_i32_1 : i32, i32, i32, i32
  }
}

module attributes {stable_mosaic.version = 11 : i64} {
  func.func @_conv_bn_kernel(%arg0: i32, %arg1: memref<1x16x16x128xbf16, #tpu.memory_space<vmem>>, %arg2: memref<1x128x128xbf16, #tpu.memory_space<vmem>>, %arg3: memref<1x128xf32, #tpu.memory_space<vmem>>, %arg4: memref<1x16x16x128xbf16, #tpu.memory_space<vmem>>) attributes {dimension_semantics = [#tpu.dimension_semantics<parallel>], iteration_bounds = array<i64: 2>, scalar_prefetch = 0 : i64, scratch_operands = 0 : i64, tpu.core_type = #tpu.core_type<tc>, window_params = [{transform_indices = @transform_0, window_bounds = array<i64: 1, 16, 16, 128>}, {pipeline_mode = #tpu.pipeline_mode<synchronous>, transform_indices = @transform_1, window_bounds = array<i64: 1, 128, 128>}, {pipeline_mode = #tpu.pipeline_mode<synchronous>, transform_indices = @transform_2, window_bounds = array<i64: 1, 128>}, {transform_indices = @transform_3, window_bounds = array<i64: 1, 16, 16, 128>}]} {
    %c0 = arith.constant 0 : index
    %c0_0 = arith.constant 0 : index
    %c0_1 = arith.constant 0 : index
    %c0_2 = arith.constant 0 : index
    %0 = vector.load %arg1[%c0, %c0_0, %c0_1, %c0_2] : memref<1x16x16x128xbf16, #tpu.memory_space<vmem>>, vector<1x16x16x128xbf16>
    %1 = vector.shape_cast %0 : vector<1x16x16x128xbf16> to vector<16x16x128xbf16>
    %2 = vector.shape_cast %1 : vector<16x16x128xbf16> to vector<256x128xbf16>
    %c0_3 = arith.constant 0 : index
    %c0_4 = arith.constant 0 : index
    %c0_5 = arith.constant 0 : index
    %3 = vector.load %arg2[%c0_3, %c0_4, %c0_5] : memref<1x128x128xbf16, #tpu.memory_space<vmem>>, vector<1x128x128xbf16>
    %4 = vector.shape_cast %3 : vector<1x128x128xbf16> to vector<128x128xbf16>
    %cst = arith.constant dense<0.000000e+00> : vector<256x128xf32>
    %5 = tpu.matmul %2, %4, %cst {dimension_numbers = #tpu.dot_dimension_numbers<[1], [0], [0], [1], [0, 0, 1, 1], [], []>} : vector<256x128xbf16>, vector<128x128xbf16>, vector<256x128xf32> -> vector<256x128xf32>
    %c0_6 = arith.constant 0 : index
    %c0_7 = arith.constant 0 : index
    %6 = vector.load %arg3[%c0_6, %c0_7] : memref<1x128xf32, #tpu.memory_space<vmem>>, vector<1x128xf32>
    %7 = vector.broadcast %6 : vector<1x128xf32> to vector<256x128xf32>
    %8 = arith.addf %5, %7 : vector<256x128xf32>
    %9 = vector.shape_cast %8 : vector<256x128xf32> to vector<16x16x128xf32>
    %cst_8 = arith.constant 0.000000e+00 : f32
    %10 = vector.broadcast %cst_8 : f32 to vector<16x16x128xf32>
    %11 = arith.maximumf %9, %10 : vector<16x16x128xf32>
    %12 = arith.truncf %11 : vector<16x16x128xf32> to vector<16x16x128xbf16>
    %c0_9 = arith.constant 0 : index
    %c0_10 = arith.constant 0 : index
    %c0_11 = arith.constant 0 : index
    %c0_12 = arith.constant 0 : index
    %13 = vector.load %arg4[%c0_9, %c0_10, %c0_11, %c0_12] : memref<1x16x16x128xbf16, #tpu.memory_space<vmem>>, vector<1x16x16x128xbf16>
    %14 = vector.shape_cast %13 : vector<1x16x16x128xbf16> to vector<16x16x128xbf16>
    %15 = vector.shape_cast %12 : vector<16x16x128xbf16> to vector<1x16x16x128xbf16>
    tpu.vector_store %arg4[%c0_9, %c0_10, %c0_11, %c0_12], %15 {strides = array<i32>} : memref<1x16x16x128xbf16, #tpu.memory_space<vmem>>, vector<1x16x16x128xbf16>,
    return
  }
  func.func @transform_0(%arg0: i32) -> (i32, i32, i32, i32) {
    %c0_i32 = arith.constant 0 : i32
    %c0_i32_0 = arith.constant 0 : i32
    %c0_i32_1 = arith.constant 0 : i32
    %c0_i32_2 = arith.constant 0 : i32
    return %arg0, %c0_i32, %c0_i32_0, %c0_i32_1 : i32, i32, i32, i32
  }
  func.func @transform_1(%arg0: i32) -> (i32, i32, i32) {
    %c0_i32 = arith.constant 0 : i32
    %c0_i32_0 = arith.constant 0 : i32
    %c0_i32_1 = arith.constant 0 : i32
    %c0_i32_2 = arith.constant 0 : i32
    return %c0_i32, %c0_i32_0, %c0_i32_1 : i32, i32, i32
  }
  func.func @transform_2(%arg0: i32) -> (i32, i32) {
    %c0_i32 = arith.constant 0 : i32
    %c0_i32_0 = arith.constant 0 : i32
    %c0_i32_1 = arith.constant 0 : i32
    return %c0_i32, %c0_i32_0 : i32, i32
  }
  func.func @transform_3(%arg0: i32) -> (i32, i32, i32, i32) {
    %c0_i32 = arith.constant 0 : i32
    %c0_i32_0 = arith.constant 0 : i32
    %c0_i32_1 = arith.constant 0 : i32
    %c0_i32_2 = arith.constant 0 : i32
    return %arg0, %c0_i32, %c0_i32_0, %c0_i32_1 : i32, i32, i32, i32
  }
}

module attributes {stable_mosaic.version = 11 : i64} {
  func.func @_conv_bn_kernel(%arg0: i32, %arg1: memref<1x9x2x9x256xbf16, #tpu.memory_space<vmem>>, %arg2: memref<9x128x128xbf16, #tpu.memory_space<vmem>>, %arg3: memref<1x128xf32, #tpu.memory_space<vmem>>, %arg4: memref<1x8x8x128xbf16, #tpu.memory_space<vmem>>) attributes {dimension_semantics = [#tpu.dimension_semantics<parallel>], iteration_bounds = array<i64: 2>, scalar_prefetch = 0 : i64, scratch_operands = 0 : i64, tpu.core_type = #tpu.core_type<tc>, window_params = [{transform_indices = @transform_0, window_bounds = array<i64: 1, 9, 2, 9, 256>}, {pipeline_mode = #tpu.pipeline_mode<synchronous>, transform_indices = @transform_1, window_bounds = array<i64: 9, 128, 128>}, {pipeline_mode = #tpu.pipeline_mode<synchronous>, transform_indices = @transform_2, window_bounds = array<i64: 1, 128>}, {transform_indices = @transform_3, window_bounds = array<i64: 1, 8, 8, 128>}]} {
    %c0 = arith.constant 0 : index
    %c0_0 = arith.constant 0 : index
    %c0_1 = arith.constant 0 : index
    %c0_2 = arith.constant 0 : index
    %c0_3 = arith.constant 0 : index
    %0 = vector.load %arg1[%c0, %c0_0, %c0_1, %c0_2, %c0_3] : memref<1x9x2x9x256xbf16, #tpu.memory_space<vmem>>, vector<1x8x1x8x128xbf16>
    %1 = vector.shape_cast %0 : vector<1x8x1x8x128xbf16> to vector<8x8x128xbf16>
    %2 = vector.shape_cast %1 : vector<8x8x128xbf16> to vector<64x128xbf16>
    %c0_4 = arith.constant 0 : index
    %c0_5 = arith.constant 0 : index
    %c0_6 = arith.constant 0 : index
    %3 = vector.load %arg2[%c0_4, %c0_5, %c0_6] : memref<9x128x128xbf16, #tpu.memory_space<vmem>>, vector<1x128x128xbf16>
    %4 = vector.shape_cast %3 : vector<1x128x128xbf16> to vector<128x128xbf16>
    %cst = arith.constant dense<0.000000e+00> : vector<64x128xf32>
    %5 = tpu.matmul %2, %4, %cst {dimension_numbers = #tpu.dot_dimension_numbers<[1], [0], [0], [1], [0, 0, 1, 1], [], []>} : vector<64x128xbf16>, vector<128x128xbf16>, vector<64x128xf32> -> vector<64x128xf32>
    %c0_7 = arith.constant 0 : index
    %c0_8 = arith.constant 0 : index
    %c0_9 = arith.constant 0 : index
    %c0_10 = arith.constant 0 : index
    %c128 = arith.constant 128 : index
    %6 = vector.load %arg1[%c0_7, %c0_8, %c0_9, %c0_10, %c128] : memref<1x9x2x9x256xbf16, #tpu.memory_space<vmem>>, vector<1x8x1x8x128xbf16>
    %7 = vector.shape_cast %6 : vector<1x8x1x8x128xbf16> to vector<8x8x128xbf16>
    %8 = vector.shape_cast %7 : vector<8x8x128xbf16> to vector<64x128xbf16>
    %c1 = arith.constant 1 : index
    %c0_11 = arith.constant 0 : index
    %c0_12 = arith.constant 0 : index
    %9 = vector.load %arg2[%c1, %c0_11, %c0_12] : memref<9x128x128xbf16, #tpu.memory_space<vmem>>, vector<1x128x128xbf16>
    %10 = vector.shape_cast %9 : vector<1x128x128xbf16> to vector<128x128xbf16>
    %cst_13 = arith.constant dense<0.000000e+00> : vector<64x128xf32>
    %11 = tpu.matmul %8, %10, %cst_13 {dimension_numbers = #tpu.dot_dimension_numbers<[1], [0], [0], [1], [0, 0, 1, 1], [], []>} : vector<64x128xbf16>, vector<128x128xbf16>, vector<64x128xf32> -> vector<64x128xf32>
    %12 = arith.addf %5, %11 : vector<64x128xf32>
    %c0_14 = arith.constant 0 : index
    %c0_15 = arith.constant 0 : index
    %c0_16 = arith.constant 0 : index
    %c1_17 = arith.constant 1 : index
    %c0_18 = arith.constant 0 : index
    %13 = vector.load %arg1[%c0_14, %c0_15, %c0_16, %c1_17, %c0_18] : memref<1x9x2x9x256xbf16, #tpu.memory_space<vmem>>, vector<1x8x1x8x128xbf16>
    %14 = vector.shape_cast %13 : vector<1x8x1x8x128xbf16> to vector<8x8x128xbf16>
    %15 = vector.shape_cast %14 : vector<8x8x128xbf16> to vector<64x128xbf16>
    %c2 = arith.constant 2 : index
    %c0_19 = arith.constant 0 : index
    %c0_20 = arith.constant 0 : index
    %16 = vector.load %arg2[%c2, %c0_19, %c0_20] : memref<9x128x128xbf16, #tpu.memory_space<vmem>>, vector<1x128x128xbf16>
    %17 = vector.shape_cast %16 : vector<1x128x128xbf16> to vector<128x128xbf16>
    %cst_21 = arith.constant dense<0.000000e+00> : vector<64x128xf32>
    %18 = tpu.matmul %15, %17, %cst_21 {dimension_numbers = #tpu.dot_dimension_numbers<[1], [0], [0], [1], [0, 0, 1, 1], [], []>} : vector<64x128xbf16>, vector<128x128xbf16>, vector<64x128xf32> -> vector<64x128xf32>
    %19 = arith.addf %12, %18 : vector<64x128xf32>
    %c0_22 = arith.constant 0 : index
    %c0_23 = arith.constant 0 : index
    %c1_24 = arith.constant 1 : index
    %c0_25 = arith.constant 0 : index
    %c0_26 = arith.constant 0 : index
    %20 = vector.load %arg1[%c0_22, %c0_23, %c1_24, %c0_25, %c0_26] : memref<1x9x2x9x256xbf16, #tpu.memory_space<vmem>>, vector<1x8x1x8x128xbf16>
    %21 = vector.shape_cast %20 : vector<1x8x1x8x128xbf16> to vector<8x8x128xbf16>
    %22 = vector.shape_cast %21 : vector<8x8x128xbf16> to vector<64x128xbf16>
    %c3 = arith.constant 3 : index
    %c0_27 = arith.constant 0 : index
    %c0_28 = arith.constant 0 : index
    %23 = vector.load %arg2[%c3, %c0_27, %c0_28] : memref<9x128x128xbf16, #tpu.memory_space<vmem>>, vector<1x128x128xbf16>
    %24 = vector.shape_cast %23 : vector<1x128x128xbf16> to vector<128x128xbf16>
    %cst_29 = arith.constant dense<0.000000e+00> : vector<64x128xf32>
    %25 = tpu.matmul %22, %24, %cst_29 {dimension_numbers = #tpu.dot_dimension_numbers<[1], [0], [0], [1], [0, 0, 1, 1], [], []>} : vector<64x128xbf16>, vector<128x128xbf16>, vector<64x128xf32> -> vector<64x128xf32>
    %26 = arith.addf %19, %25 : vector<64x128xf32>
    %c0_30 = arith.constant 0 : index
    %c0_31 = arith.constant 0 : index
    %c1_32 = arith.constant 1 : index
    %c0_33 = arith.constant 0 : index
    %c128_34 = arith.constant 128 : index
    %27 = vector.load %arg1[%c0_30, %c0_31, %c1_32, %c0_33, %c128_34] : memref<1x9x2x9x256xbf16, #tpu.memory_space<vmem>>, vector<1x8x1x8x128xbf16>
    %28 = vector.shape_cast %27 : vector<1x8x1x8x128xbf16> to vector<8x8x128xbf16>
    %29 = vector.shape_cast %28 : vector<8x8x128xbf16> to vector<64x128xbf16>
    %c4 = arith.constant 4 : index
    %c0_35 = arith.constant 0 : index
    %c0_36 = arith.constant 0 : index
    %30 = vector.load %arg2[%c4, %c0_35, %c0_36] : memref<9x128x128xbf16, #tpu.memory_space<vmem>>, vector<1x128x128xbf16>
    %31 = vector.shape_cast %30 : vector<1x128x128xbf16> to vector<128x128xbf16>
    %cst_37 = arith.constant dense<0.000000e+00> : vector<64x128xf32>
    %32 = tpu.matmul %29, %31, %cst_37 {dimension_numbers = #tpu.dot_dimension_numbers<[1], [0], [0], [1], [0, 0, 1, 1], [], []>} : vector<64x128xbf16>, vector<128x128xbf16>, vector<64x128xf32> -> vector<64x128xf32>
    %33 = arith.addf %26, %32 : vector<64x128xf32>
    %c0_38 = arith.constant 0 : index
    %c0_39 = arith.constant 0 : index
    %c1_40 = arith.constant 1 : index
    %c1_41 = arith.constant 1 : index
    %c0_42 = arith.constant 0 : index
    %34 = vector.load %arg1[%c0_38, %c0_39, %c1_40, %c1_41, %c0_42] : memref<1x9x2x9x256xbf16, #tpu.memory_space<vmem>>, vector<1x8x1x8x128xbf16>
    %35 = vector.shape_cast %34 : vector<1x8x1x8x128xbf16> to vector<8x8x128xbf16>
    %36 = vector.shape_cast %35 : vector<8x8x128xbf16> to vector<64x128xbf16>
    %c5 = arith.constant 5 : index
    %c0_43 = arith.constant 0 : index
    %c0_44 = arith.constant 0 : index
    %37 = vector.load %arg2[%c5, %c0_43, %c0_44] : memref<9x128x128xbf16, #tpu.memory_space<vmem>>, vector<1x128x128xbf16>
    %38 = vector.shape_cast %37 : vector<1x128x128xbf16> to vector<128x128xbf16>
    %cst_45 = arith.constant dense<0.000000e+00> : vector<64x128xf32>
    %39 = tpu.matmul %36, %38, %cst_45 {dimension_numbers = #tpu.dot_dimension_numbers<[1], [0], [0], [1], [0, 0, 1, 1], [], []>} : vector<64x128xbf16>, vector<128x128xbf16>, vector<64x128xf32> -> vector<64x128xf32>
    %40 = arith.addf %33, %39 : vector<64x128xf32>
    %c0_46 = arith.constant 0 : index
    %c1_47 = arith.constant 1 : index
    %c0_48 = arith.constant 0 : index
    %c0_49 = arith.constant 0 : index
    %c0_50 = arith.constant 0 : index
    %41 = vector.load %arg1[%c0_46, %c1_47, %c0_48, %c0_49, %c0_50] : memref<1x9x2x9x256xbf16, #tpu.memory_space<vmem>>, vector<1x8x1x8x128xbf16>
    %42 = vector.shape_cast %41 : vector<1x8x1x8x128xbf16> to vector<8x8x128xbf16>
    %43 = vector.shape_cast %42 : vector<8x8x128xbf16> to vector<64x128xbf16>
    %c6 = arith.constant 6 : index
    %c0_51 = arith.constant 0 : index
    %c0_52 = arith.constant 0 : index
    %44 = vector.load %arg2[%c6, %c0_51, %c0_52] : memref<9x128x128xbf16, #tpu.memory_space<vmem>>, vector<1x128x128xbf16>
    %45 = vector.shape_cast %44 : vector<1x128x128xbf16> to vector<128x128xbf16>
    %cst_53 = arith.constant dense<0.000000e+00> : vector<64x128xf32>
    %46 = tpu.matmul %43, %45, %cst_53 {dimension_numbers = #tpu.dot_dimension_numbers<[1], [0], [0], [1], [0, 0, 1, 1], [], []>} : vector<64x128xbf16>, vector<128x128xbf16>, vector<64x128xf32> -> vector<64x128xf32>
    %47 = arith.addf %40, %46 : vector<64x128xf32>
    %c0_54 = arith.constant 0 : index
    %c1_55 = arith.constant 1 : index
    %c0_56 = arith.constant 0 : index
    %c0_57 = arith.constant 0 : index
    %c128_58 = arith.constant 128 : index
    %48 = vector.load %arg1[%c0_54, %c1_55, %c0_56, %c0_57, %c128_58] : memref<1x9x2x9x256xbf16, #tpu.memory_space<vmem>>, vector<1x8x1x8x128xbf16>
    %49 = vector.shape_cast %48 : vector<1x8x1x8x128xbf16> to vector<8x8x128xbf16>
    %50 = vector.shape_cast %49 : vector<8x8x128xbf16> to vector<64x128xbf16>
    %c7 = arith.constant 7 : index
    %c0_59 = arith.constant 0 : index
    %c0_60 = arith.constant 0 : index
    %51 = vector.load %arg2[%c7, %c0_59, %c0_60] : memref<9x128x128xbf16, #tpu.memory_space<vmem>>, vector<1x128x128xbf16>
    %52 = vector.shape_cast %51 : vector<1x128x128xbf16> to vector<128x128xbf16>
    %cst_61 = arith.constant dense<0.000000e+00> : vector<64x128xf32>
    %53 = tpu.matmul %50, %52, %cst_61 {dimension_numbers = #tpu.dot_dimension_numbers<[1], [0], [0], [1], [0, 0, 1, 1], [], []>} : vector<64x128xbf16>, vector<128x128xbf16>, vector<64x128xf32> -> vector<64x128xf32>
    %54 = arith.addf %47, %53 : vector<64x128xf32>
    %c0_62 = arith.constant 0 : index
    %c1_63 = arith.constant 1 : index
    %c0_64 = arith.constant 0 : index
    %c1_65 = arith.constant 1 : index
    %c0_66 = arith.constant 0 : index
    %55 = vector.load %arg1[%c0_62, %c1_63, %c0_64, %c1_65, %c0_66] : memref<1x9x2x9x256xbf16, #tpu.memory_space<vmem>>, vector<1x8x1x8x128xbf16>
    %56 = vector.shape_cast %55 : vector<1x8x1x8x128xbf16> to vector<8x8x128xbf16>
    %57 = vector.shape_cast %56 : vector<8x8x128xbf16> to vector<64x128xbf16>
    %c8 = arith.constant 8 : index
    %c0_67 = arith.constant 0 : index
    %c0_68 = arith.constant 0 : index
    %58 = vector.load %arg2[%c8, %c0_67, %c0_68] : memref<9x128x128xbf16, #tpu.memory_space<vmem>>, vector<1x128x128xbf16>
    %59 = vector.shape_cast %58 : vector<1x128x128xbf16> to vector<128x128xbf16>
    %cst_69 = arith.constant dense<0.000000e+00> : vector<64x128xf32>
    %60 = tpu.matmul %57, %59, %cst_69 {dimension_numbers = #tpu.dot_dimension_numbers<[1], [0], [0], [1], [0, 0, 1, 1], [], []>} : vector<64x128xbf16>, vector<128x128xbf16>, vector<64x128xf32> -> vector<64x128xf32>
    %61 = arith.addf %54, %60 : vector<64x128xf32>
    %c0_70 = arith.constant 0 : index
    %c0_71 = arith.constant 0 : index
    %62 = vector.load %arg3[%c0_70, %c0_71] : memref<1x128xf32, #tpu.memory_space<vmem>>, vector<1x128xf32>
    %63 = vector.broadcast %62 : vector<1x128xf32> to vector<64x128xf32>
    %64 = arith.addf %61, %63 : vector<64x128xf32>
    %65 = vector.shape_cast %64 : vector<64x128xf32> to vector<8x8x128xf32>
    %cst_72 = arith.constant 0.000000e+00 : f32
    %66 = vector.broadcast %cst_72 : f32 to vector<8x8x128xf32>
    %67 = arith.maximumf %65, %66 : vector<8x8x128xf32>
    %68 = arith.truncf %67 : vector<8x8x128xf32> to vector<8x8x128xbf16>
    %c0_73 = arith.constant 0 : index
    %c0_74 = arith.constant 0 : index
    %c0_75 = arith.constant 0 : index
    %c0_76 = arith.constant 0 : index
    %69 = vector.load %arg4[%c0_73, %c0_74, %c0_75, %c0_76] : memref<1x8x8x128xbf16, #tpu.memory_space<vmem>>, vector<1x8x8x128xbf16>
    %70 = vector.shape_cast %69 : vector<1x8x8x128xbf16> to vector<8x8x128xbf16>
    %71 = vector.shape_cast %68 : vector<8x8x128xbf16> to vector<1x8x8x128xbf16>
    tpu.vector_store %arg4[%c0_73, %c0_74, %c0_75, %c0_76], %71 {strides = array<i32>} : memref<1x8x8x128xbf16, #tpu.memory_space<vmem>>, vector<1x8x8x128xbf16>,
    return
  }
  func.func @transform_0(%arg0: i32) -> (i32, i32, i32, i32, i32) {
    %c0_i32 = arith.constant 0 : i32
    %c0_i32_0 = arith.constant 0 : i32
    %c0_i32_1 = arith.constant 0 : i32
    %c0_i32_2 = arith.constant 0 : i32
    %c0_i32_3 = arith.constant 0 : i32
    return %arg0, %c0_i32, %c0_i32_0, %c0_i32_1, %c0_i32_2 : i32, i32, i32, i32, i32
  }
  func.func @transform_1(%arg0: i32) -> (i32, i32, i32) {
    %c0_i32 = arith.constant 0 : i32
    %c0_i32_0 = arith.constant 0 : i32
    %c0_i32_1 = arith.constant 0 : i32
    %c0_i32_2 = arith.constant 0 : i32
    return %c0_i32, %c0_i32_0, %c0_i32_1 : i32, i32, i32
  }
  func.func @transform_2(%arg0: i32) -> (i32, i32) {
    %c0_i32 = arith.constant 0 : i32
    %c0_i32_0 = arith.constant 0 : i32
    %c0_i32_1 = arith.constant 0 : i32
    return %c0_i32, %c0_i32_0 : i32, i32
  }
  func.func @transform_3(%arg0: i32) -> (i32, i32, i32, i32) {
    %c0_i32 = arith.constant 0 : i32
    %c0_i32_0 = arith.constant 0 : i32
    %c0_i32_1 = arith.constant 0 : i32
    %c0_i32_2 = arith.constant 0 : i32
    return %arg0, %c0_i32, %c0_i32_0, %c0_i32_1 : i32, i32, i32, i32
  }
}

module attributes {stable_mosaic.version = 11 : i64} {
  func.func @_conv_bn_kernel(%arg0: i32, %arg1: memref<1x8x8x128xbf16, #tpu.memory_space<vmem>>, %arg2: memref<1x128x128xbf16, #tpu.memory_space<vmem>>, %arg3: memref<1x128xf32, #tpu.memory_space<vmem>>, %arg4: memref<1x8x8x128xbf16, #tpu.memory_space<vmem>>, %arg5: memref<1x8x8x128xbf16, #tpu.memory_space<vmem>>) attributes {dimension_semantics = [#tpu.dimension_semantics<parallel>], iteration_bounds = array<i64: 2>, scalar_prefetch = 0 : i64, scratch_operands = 0 : i64, tpu.core_type = #tpu.core_type<tc>, window_params = [{transform_indices = @transform_0, window_bounds = array<i64: 1, 8, 8, 128>}, {pipeline_mode = #tpu.pipeline_mode<synchronous>, transform_indices = @transform_1, window_bounds = array<i64: 1, 128, 128>}, {pipeline_mode = #tpu.pipeline_mode<synchronous>, transform_indices = @transform_2, window_bounds = array<i64: 1, 128>}, {transform_indices = @transform_3, window_bounds = array<i64: 1, 8, 8, 128>}, {transform_indices = @transform_4, window_bounds = array<i64: 1, 8, 8, 128>}]} {
    %c0 = arith.constant 0 : index
    %c0_0 = arith.constant 0 : index
    %c0_1 = arith.constant 0 : index
    %c0_2 = arith.constant 0 : index
    %0 = vector.load %arg1[%c0, %c0_0, %c0_1, %c0_2] : memref<1x8x8x128xbf16, #tpu.memory_space<vmem>>, vector<1x8x8x128xbf16>
    %1 = vector.shape_cast %0 : vector<1x8x8x128xbf16> to vector<8x8x128xbf16>
    %2 = vector.shape_cast %1 : vector<8x8x128xbf16> to vector<64x128xbf16>
    %c0_3 = arith.constant 0 : index
    %c0_4 = arith.constant 0 : index
    %c0_5 = arith.constant 0 : index
    %3 = vector.load %arg2[%c0_3, %c0_4, %c0_5] : memref<1x128x128xbf16, #tpu.memory_space<vmem>>, vector<1x128x128xbf16>
    %4 = vector.shape_cast %3 : vector<1x128x128xbf16> to vector<128x128xbf16>
    %cst = arith.constant dense<0.000000e+00> : vector<64x128xf32>
    %5 = tpu.matmul %2, %4, %cst {dimension_numbers = #tpu.dot_dimension_numbers<[1], [0], [0], [1], [0, 0, 1, 1], [], []>} : vector<64x128xbf16>, vector<128x128xbf16>, vector<64x128xf32> -> vector<64x128xf32>
    %c0_6 = arith.constant 0 : index
    %c0_7 = arith.constant 0 : index
    %6 = vector.load %arg3[%c0_6, %c0_7] : memref<1x128xf32, #tpu.memory_space<vmem>>, vector<1x128xf32>
    %7 = vector.broadcast %6 : vector<1x128xf32> to vector<64x128xf32>
    %8 = arith.addf %5, %7 : vector<64x128xf32>
    %9 = vector.shape_cast %8 : vector<64x128xf32> to vector<8x8x128xf32>
    %c0_8 = arith.constant 0 : index
    %c0_9 = arith.constant 0 : index
    %c0_10 = arith.constant 0 : index
    %c0_11 = arith.constant 0 : index
    %10 = vector.load %arg4[%c0_8, %c0_9, %c0_10, %c0_11] : memref<1x8x8x128xbf16, #tpu.memory_space<vmem>>, vector<1x8x8x128xbf16>
    %11 = vector.shape_cast %10 : vector<1x8x8x128xbf16> to vector<8x8x128xbf16>
    %12 = arith.extf %11 : vector<8x8x128xbf16> to vector<8x8x128xf32>
    %13 = arith.addf %9, %12 : vector<8x8x128xf32>
    %cst_12 = arith.constant 0.000000e+00 : f32
    %14 = vector.broadcast %cst_12 : f32 to vector<8x8x128xf32>
    %15 = arith.maximumf %13, %14 : vector<8x8x128xf32>
    %16 = arith.truncf %15 : vector<8x8x128xf32> to vector<8x8x128xbf16>
    %c0_13 = arith.constant 0 : index
    %c0_14 = arith.constant 0 : index
    %c0_15 = arith.constant 0 : index
    %c0_16 = arith.constant 0 : index
    %17 = vector.load %arg5[%c0_13, %c0_14, %c0_15, %c0_16] : memref<1x8x8x128xbf16, #tpu.memory_space<vmem>>, vector<1x8x8x128xbf16>
    %18 = vector.shape_cast %17 : vector<1x8x8x128xbf16> to vector<8x8x128xbf16>
    %19 = vector.shape_cast %16 : vector<8x8x128xbf16> to vector<1x8x8x128xbf16>
    tpu.vector_store %arg5[%c0_13, %c0_14, %c0_15, %c0_16], %19 {strides = array<i32>} : memref<1x8x8x128xbf16, #tpu.memory_space<vmem>>, vector<1x8x8x128xbf16>,
    return
  }
  func.func @transform_0(%arg0: i32) -> (i32, i32, i32, i32) {
    %c0_i32 = arith.constant 0 : i32
    %c0_i32_0 = arith.constant 0 : i32
    %c0_i32_1 = arith.constant 0 : i32
    %c0_i32_2 = arith.constant 0 : i32
    return %arg0, %c0_i32, %c0_i32_0, %c0_i32_1 : i32, i32, i32, i32
  }
  func.func @transform_1(%arg0: i32) -> (i32, i32, i32) {
    %c0_i32 = arith.constant 0 : i32
    %c0_i32_0 = arith.constant 0 : i32
    %c0_i32_1 = arith.constant 0 : i32
    %c0_i32_2 = arith.constant 0 : i32
    return %c0_i32, %c0_i32_0, %c0_i32_1 : i32, i32, i32
  }
  func.func @transform_2(%arg0: i32) -> (i32, i32) {
    %c0_i32 = arith.constant 0 : i32
    %c0_i32_0 = arith.constant 0 : i32
    %c0_i32_1 = arith.constant 0 : i32
    return %c0_i32, %c0_i32_0 : i32, i32
  }
  func.func @transform_3(%arg0: i32) -> (i32, i32, i32, i32) {
    %c0_i32 = arith.constant 0 : i32
    %c0_i32_0 = arith.constant 0 : i32
    %c0_i32_1 = arith.constant 0 : i32
    %c0_i32_2 = arith.constant 0 : i32
    return %arg0, %c0_i32, %c0_i32_0, %c0_i32_1 : i32, i32, i32, i32
  }
  func.func @transform_4(%arg0: i32) -> (i32, i32, i32, i32) {
    %c0_i32 = arith.constant 0 : i32
    %c0_i32_0 = arith.constant 0 : i32
    %c0_i32_1 = arith.constant 0 : i32
    %c0_i32_2 = arith.constant 0 : i32
    return %arg0, %c0_i32, %c0_i32_0, %c0_i32_1 : i32, i32, i32, i32
  }
}

</mosaic_0001>

<bundles_post_ra>
// kernel: _lambda_.6
= control target key start
LH: loop header
LB: loop body
LE: loop exit
PB: predicated region body
PF: predicated region fallthrough
CT: control target
= control target key end

     0   :  { %s560_s12 = smov 0   ;;  %s614_s0 = inlined_call_operand.vmem [shape: bf16[2,8,2,8,256], index: 0, kind: input, shape index: {}]   ;;  %s615_s1 = inlined_call_operand.vmem [shape: bf16[1,128,128], index: 1, kind: input, shape index: {}]   ;;  %s616_s2 = inlined_call_operand.vmem [shape: f32[1,128], index: 2, kind: input, shape index: {}]   ;;  %s617_s3 = inlined_call_operand.vmem [shape: bf16[2,8,8,128], index: 3, kind: output, shape index: {}]  }
   0x1 LB: > { %s411_s13 = sadd.s32 4294967295, %s538_s12   ;;  %p415_p0 = scmp.ge.s32.totalorder %s538_s12, 1  ;;  %s538_s12 = sphi %s560_s12, %s13_s12  }
   0x2   : > { %p137_p1 = scmp.lt.s32.totalorder %s538_s12, 3 }
   0x4   : > { %p138_p2 = pnand %p415_p0, %p137_p1 }
   0x5   : > { %v520_v0 = vld [vmem:[%s615_s1] sm:$0xff] (!%p138_p2)   ;;  %p161_p3 = scmp.lt.s32.totalorder (!%p138_p2), %s411_s13, 1  ;;  %v521_v1 = vld [vmem:[%s615_s1 + $0x8] sm:$0xff] (!%p138_p2)   ;;  %v522_v2 = vld [vmem:[%s615_s1 + $0x10] sm:$0xff] (!%p138_p2)  }
   0x6   : > { %141 = sbr.rel (%p138_p2) target bundleno = 258 (0x102), region = 32  ;;  %472 = vmatprep.subr.bf16.mxu0 (!%p138_p2), %v520_v0  ;;  %496 = vmatprep.subr.bf16.mxu1 (!%p138_p2), %v520_v0  ;;  %v523_v3 = vld [vmem:[%s615_s1 + $0x18] sm:$0xff] (!%p138_p2)   ;;  %v524_v6 = vld [vmem:[%s615_s1 + $0x20] sm:$0xff] (!%p138_p2)   ;;  %v525_v7 = vld [vmem:[%s615_s1 + $0x28] sm:$0xff] (!%p138_p2)  }
   0x7   : > { %473 = vmatpush3.bf16.msra.mxu0 (!%p138_p2), %v520_v0  ;;  %504 = vmatpush3.bf16.msra.mxu1 (!%p138_p2), %v520_v0  ;;  %v526_v8 = vld [vmem:[%s615_s1 + $0x30] sm:$0xff] (!%p138_p2)   ;;  %v527_v9 = vld [vmem:[%s615_s1 + $0x38] sm:$0xff] (!%p138_p2)   ;;  %v420_v13 = vld [vmem:[%s616_s2] ss:$0 sm:$0xff] (!%p138_p2) }
   0x8   : > { %474 = vmatprep.subr.bf16.mxu0 (!%p138_p2), %v521_v1  ;;  %497 = vmatprep.subr.bf16.mxu1 (!%p138_p2), %v521_v1 }
   0xb   : > { %475 = vmatpush3.bf16.msra.mxu0 (!%p138_p2), %v521_v1  ;;  %505 = vmatpush3.bf16.msra.mxu1 (!%p138_p2), %v521_v1 }
   0xc   : > { %476 = vmatprep.subr.bf16.mxu0 (!%p138_p2), %v522_v2  ;;  %498 = vmatprep.subr.bf16.mxu1 (!%p138_p2), %v522_v2 }
   0xd   : > { %s619_s13 = smov (!%p161_p3, %s411_s13), 1 }
   0xe   : > { %s435_s20 = sshll.u32 %s619_s13, 7  ;;  %s436_s9 = sshll.u32 %s619_s13, 5 }
   0xf   : > { %s583_s23 = scalar_lea.vmem %s614_s0, %s435_s20  ;;  %477 = vmatpush3.bf16.msra.mxu0 %v522_v2  ;;  %506 = vmatpush3.bf16.msra.mxu1 %v522_v2  ;;  %s170_s14 = scalar_lea.vmem %s617_s3, %s436_s9 }
  0x10   : > { %v528_v4 = vld [vmem:[%s583_s23] ss:$16 sps:$4 sm:$0xff]   ;;  %478 = vmatprep.subr.bf16.mxu0 %v523_v3  ;;  %499 = vmatprep.subr.bf16.mxu1 %v523_v3 }
  0x11   : > { %v529_v5 = vld [vmem:[%s583_s23 + $0x40] ss:$16 sps:$4 sm:$0xff]   ;;  %488 = vmatprep.mubr.bf16.mxu0 %v528_v4 }
  0x12   : > { %492 = vmatprep.mubr.bf16.mxu1 %v529_v5  ;;  %v530_v10 = vld [vmem:[%s583_s23 + $0x20] ss:$16 sps:$4 sm:$0xff]  }
  0x13   : > { %479 = vmatpush3.bf16.msra.mxu0 %v523_v3  ;;  %507 = vmatpush3.bf16.msra.mxu1 %v523_v3  ;;  %v531_v11 = vld [vmem:[%s583_s23 + $0x60] ss:$16 sps:$4 sm:$0xff]  }
  0x14   : > { %480 = vmatprep.subr.bf16.mxu0 %v524_v6  ;;  %500 = vmatprep.subr.bf16.mxu1 %v524_v6 }
  0x17   : > { %481 = vmatpush3.bf16.msra.mxu0 %v524_v6  ;;  %508 = vmatpush3.bf16.msra.mxu1 %v524_v6 }
  0x18   : > { %482 = vmatprep.subr.bf16.mxu0 %v525_v7  ;;  %501 = vmatprep.subr.bf16.mxu1 %v525_v7 }
  0x1b   : > { %483 = vmatpush3.bf16.msra.mxu0 %v525_v7  ;;  %509 = vmatpush3.bf16.msra.mxu1 %v525_v7 }
  0x1c   : > { %484 = vmatprep.subr.bf16.mxu0 %v526_v8  ;;  %502 = vmatprep.subr.bf16.mxu1 %v526_v8 }
  0x1f   : > { %485 = vmatpush3.bf16.msra.mxu0 %v526_v8  ;;  %510 = vmatpush3.bf16.msra.mxu1 %v526_v8 }
  0x20   : > { %486 = vmatprep.subr.bf16.mxu0 %v527_v9  ;;  %503 = vmatprep.subr.bf16.mxu1 %v527_v9 }
  0x23   : > { %487 = vmatpush3.bf16.msra.mxu0 %v527_v9  ;;  %511 = vmatpush3.bf16.msra.mxu1 %v527_v9 }
  0x26   : > { %489 = vmatmul.mubr.bf16.vlgmr.msra.gmra.mrb[0].mxu0 %v530_v10  ;;  %493 = vmatmul.mubr.bf16.vlgmr.msra.gmra.mrb[0].mxu1 %v531_v11 }
  0xf9   : > { %v490_v12 = vpop.f32.mrb[0].mxu0  ;;  %v494_v14 = vpop.f32.mrb[0].mxu1 }
  0xfa   : > { %v309_v15 = vpop.f32.mrb[1].mxu0  ;;  %v325_v16 = vpop.f32.mrb[1].mxu1  ;;  %v318_v19 = vadd.f32 %v490_v12, %v420_v13  ;;  %v334_v20 = vadd.f32 %v494_v14, %v420_v13 }
  0xfb   : > { %v491_v17 = vpop.f32.mrb[2].mxu0  ;;  %v495_v18 = vpop.f32.mrb[2].mxu1  ;;  %v310_v25 = vadd.f32 %v420_v13, %v309_v15  ;;  %v326_v26 = vadd.f32 %v420_v13, %v325_v16 }
  0xfc   : > { %v321_v21 = vadd.f32 %v491_v17, %v420_v13  ;;  %v337_v22 = vadd.f32 %v495_v18, %v420_v13  ;;  %v312_v23 = vpop.f32.mrb[3].mxu0  ;;  %v328_v24 = vpop.f32.mrb[3].mxu1 }
  0xfd   : > { %v313_v27 = vadd.f32 %v420_v13, %v312_v23  ;;  %v329_v28 = vadd.f32 %v420_v13, %v328_v24 }
  0xfe   : > { %v445_v29 = vpack.c.bf16 %v321_v21, %v318_v19  ;;  %v455_v30 = vpack.c.bf16 %v337_v22, %v334_v20 }
  0xff   : > { %v440_v31 = vpack.c.bf16 %v313_v27, %v310_v25  ;;  %v450_v32 = vpack.c.bf16 %v329_v28, %v326_v26 }
 0x100   : > { %457 = vst [vmem:[%s170_s14 + $0x8] sm:$0xff] %v445_v29   ;;  %459 = vst [vmem:[%s170_s14 + $0x18] sm:$0xff] %v455_v30  }
 0x101   : > { %441 = vst [vmem:[%s170_s14] sm:$0xff] %v440_v31   ;;  %458 = vst [vmem:[%s170_s14 + $0x10] sm:$0xff] %v450_v32  }
 0x102 PF: > { %s13_s12 = sadd.s32 1, %s538_s12  }
 0x103   : > { %p10_p4 = scmp.ge.s32.totalorder %s13_s12, 4  }
 0x105   :  { %12 = sbr.rel (!%p10_p4) target bundleno = 1 (0x1), region = 62 }

// kernel: _lambda_.4
= control target key start
LH: loop header
LB: loop body
LE: loop exit
PB: predicated region body
PF: predicated region fallthrough
CT: control target
= control target key end

     0   :  { %s1124_s12 = smov 0   ;;  %s1245_s0 = inlined_call_operand.vmem [shape: bf16[2,16,16,128], index: 0, kind: input, shape index: {}]   ;;  %s1246_s1 = inlined_call_operand.vmem [shape: bf16[1,128,128], index: 1, kind: input, shape index: {}]   ;;  %s1247_s2 = inlined_call_operand.vmem [shape: f32[1,128], index: 2, kind: input, shape index: {}]   ;;  %s1248_s3 = inlined_call_operand.vmem [shape: bf16[2,16,16,128], index: 3, kind: output, shape index: {}]  }
   0x1 LB: > { %s779_s13 = sadd.s32 4294967295, %s1102_s12   ;;  %p783_p0 = scmp.ge.s32.totalorder %s1102_s12, 1  ;;  %s1102_s12 = sphi %s1124_s12, %s13_s12  }
   0x2   : > { %p137_p1 = scmp.lt.s32.totalorder %s1102_s12, 3 }
   0x4   : > { %p138_p2 = pnand %p783_p0, %p137_p1 }
   0x5   : > { %v1072_v0 = vld [vmem:[%s1246_s1] sm:$0xff] (!%p138_p2)   ;;  %p161_p3 = scmp.lt.s32.totalorder (!%p138_p2), %s779_s13, 1  ;;  %v1073_v1 = vld [vmem:[%s1246_s1 + $0x8] sm:$0xff] (!%p138_p2)   ;;  %v1074_v2 = vld [vmem:[%s1246_s1 + $0x10] sm:$0xff] (!%p138_p2)  }
   0x6   : > { %141 = sbr.rel (%p138_p2) target bundleno = 284 (0x11c), region = 32  ;;  %1000 = vmatprep.subr.bf16.mxu0 (!%p138_p2), %v1072_v0  ;;  %1048 = vmatprep.subr.bf16.mxu1 (!%p138_p2), %v1072_v0  ;;  %v1075_v3 = vld [vmem:[%s1246_s1 + $0x18] sm:$0xff] (!%p138_p2)   ;;  %v1076_v6 = vld [vmem:[%s1246_s1 + $0x20] sm:$0xff] (!%p138_p2)   ;;  %v1077_v7 = vld [vmem:[%s1246_s1 + $0x28] sm:$0xff] (!%p138_p2)  }
   0x7   : > { %1001 = vmatpush3.bf16.msra.mxu0 (!%p138_p2), %v1072_v0  ;;  %1056 = vmatpush3.bf16.msra.mxu1 (!%p138_p2), %v1072_v0  ;;  %v1078_v8 = vld [vmem:[%s1246_s1 + $0x30] sm:$0xff] (!%p138_p2)   ;;  %v1079_v9 = vld [vmem:[%s1246_s1 + $0x38] sm:$0xff] (!%p138_p2)   ;;  %v1185_v24 = vld [vmem:[%s1247_s2] ss:$0 sm:$0xff] (!%p138_p2) }
   0x8   : > { %1002 = vmatprep.subr.bf16.mxu0 (!%p138_p2), %v1073_v1  ;;  %1049 = vmatprep.subr.bf16.mxu1 (!%p138_p2), %v1073_v1 }
   0xb   : > { %1003 = vmatpush3.bf16.msra.mxu0 (!%p138_p2), %v1073_v1  ;;  %1057 = vmatpush3.bf16.msra.mxu1 (!%p138_p2), %v1073_v1 }
   0xc   : > { %1004 = vmatprep.subr.bf16.mxu0 (!%p138_p2), %v1074_v2  ;;  %1050 = vmatprep.subr.bf16.mxu1 (!%p138_p2), %v1074_v2 }
   0xd   : > { %s1250_s13 = smov (!%p161_p3, %s779_s13), 1 }
   0xe   : > { %s847_s20 = sshll.u32 %s1250_s13, 7 }
   0xf   : > { %s1149_s23 = scalar_lea.vmem %s1245_s0, %s847_s20  ;;  %1005 = vmatpush3.bf16.msra.mxu0 %v1074_v2  ;;  %1058 = vmatpush3.bf16.msra.mxu1 %v1074_v2  ;;  %s1200_s11 = scalar_lea.vmem %s1248_s3, %s847_s20 }
  0x10   : > { %v1080_v4 = vld [vmem:[%s1149_s23] sm:$0xff]   ;;  %1006 = vmatprep.subr.bf16.mxu0 %v1075_v3  ;;  %1051 = vmatprep.subr.bf16.mxu1 %v1075_v3  ;;  %v1082_v10 = vld [vmem:[%s1149_s23 + $0x8] sm:$0xff]   ;;  %v1084_v12 = vld [vmem:[%s1149_s23 + $0x10] sm:$0xff]  }
  0x11   : > { %v1081_v5 = vld [vmem:[%s1149_s23 + $0x40] sm:$0xff]   ;;  %1016 = vmatprep.mubr.bf16.mxu0 %v1080_v4  ;;  %v1083_v11 = vld [vmem:[%s1149_s23 + $0x48] sm:$0xff]   ;;  %v1085_v13 = vld [vmem:[%s1149_s23 + $0x50] sm:$0xff]  }
  0x12   : > { %1032 = vmatprep.mubr.bf16.mxu1 %v1081_v5  ;;  %v1086_v14 = vld [vmem:[%s1149_s23 + $0x18] sm:$0xff]   ;;  %v1088_v16 = vld [vmem:[%s1149_s23 + $0x20] sm:$0xff]   ;;  %v1090_v18 = vld [vmem:[%s1149_s23 + $0x28] sm:$0xff]  }
  0x13   : > { %1007 = vmatpush3.bf16.msra.mxu0 %v1075_v3  ;;  %1059 = vmatpush3.bf16.msra.mxu1 %v1075_v3  ;;  %v1087_v15 = vld [vmem:[%s1149_s23 + $0x58] sm:$0xff]   ;;  %v1089_v17 = vld [vmem:[%s1149_s23 + $0x60] sm:$0xff]   ;;  %v1091_v19 = vld [vmem:[%s1149_s23 + $0x68] sm:$0xff]  }
  0x14   : > { %1008 = vmatprep.subr.bf16.mxu0 %v1076_v6  ;;  %1052 = vmatprep.subr.bf16.mxu1 %v1076_v6  ;;  %v1092_v20 = vld [vmem:[%s1149_s23 + $0x30] sm:$0xff]   ;;  %v1094_v22 = vld [vmem:[%s1149_s23 + $0x38] sm:$0xff]  }
  0x15   : > { %v1093_v21 = vld [vmem:[%s1149_s23 + $0x70] sm:$0xff]   ;;  %v1095_v23 = vld [vmem:[%s1149_s23 + $0x78] sm:$0xff]  }
  0x17   : > { %1009 = vmatpush3.bf16.msra.mxu0 %v1076_v6  ;;  %1060 = vmatpush3.bf16.msra.mxu1 %v1076_v6 }
  0x18   : > { %1010 = vmatprep.subr.bf16.mxu0 %v1077_v7  ;;  %1053 = vmatprep.subr.bf16.mxu1 %v1077_v7 }
  0x1b   : > { %1011 = vmatpush3.bf16.msra.mxu0 %v1077_v7  ;;  %1061 = vmatpush3.bf16.msra.mxu1 %v1077_v7 }
  0x1c   : > { %1012 = vmatprep.subr.bf16.mxu0 %v1078_v8  ;;  %1054 = vmatprep.subr.bf16.mxu1 %v1078_v8 }
  0x1f   : > { %1013 = vmatpush3.bf16.msra.mxu0 %v1078_v8  ;;  %1062 = vmatpush3.bf16.msra.mxu1 %v1078_v8 }
  0x20   : > { %1014 = vmatprep.subr.bf16.mxu0 %v1079_v9  ;;  %1055 = vmatprep.subr.bf16.mxu1 %v1079_v9 }
  0x23   : > { %1015 = vmatpush3.bf16.msra.mxu0 %v1079_v9  ;;  %1063 = vmatpush3.bf16.msra.mxu1 %v1079_v9 }
  0x26   : > { %1017 = vmatmul.mubr.bf16.vlgmr.msra.gmra.mrb[0].mxu0 %v1082_v10  ;;  %1033 = vmatmul.mubr.bf16.vlgmr.msra.gmra.mrb[0].mxu1 %v1083_v11 }
  0x27   : > { %1020 = vmatprep.mubr.bf16.mxu0 %v1084_v12  ;;  %1036 = vmatprep.mubr.bf16.mxu1 %v1085_v13 }
  0x2e   : > { %1021 = vmatmul.mubr.bf16.gmra.mrb[4].mxu0 %v1086_v14  ;;  %1037 = vmatmul.mubr.bf16.gmra.mrb[4].mxu1 %v1087_v15 }
  0x2f   : > { %1024 = vmatprep.mubr.bf16.mxu0 %v1088_v16  ;;  %1040 = vmatprep.mubr.bf16.mxu1 %v1089_v17 }
  0x36   : > { %1025 = vmatmul.mubr.bf16.gmra.mrb[8].mxu0 %v1090_v18  ;;  %1041 = vmatmul.mubr.bf16.gmra.mrb[8].mxu1 %v1091_v19 }
  0x37   : > { %1028 = vmatprep.mubr.bf16.mxu0 %v1092_v20  ;;  %1044 = vmatprep.mubr.bf16.mxu1 %v1093_v21 }
  0x3e   : > { %1029 = vmatmul.mubr.bf16.gmra.mrb[12].mxu0 %v1094_v22  ;;  %1045 = vmatmul.mubr.bf16.gmra.mrb[12].mxu1 %v1095_v23 }
  0xf9   : > { %v1018_v25 = vpop.f32.mrb[0].mxu0  ;;  %v1034_v26 = vpop.f32.mrb[0].mxu1 }
  0xfa   : > { %v414_v27 = vadd.f32 %v1018_v25, %v1185_v24  ;;  %v478_v28 = vadd.f32 %v1034_v26, %v1185_v24  ;;  %v405_v29 = vpop.f32.mrb[1].mxu0  ;;  %v469_v30 = vpop.f32.mrb[1].mxu1 }
  0xfb   : > { %v406_v31 = vadd.f32 %v1185_v24, %v405_v29  ;;  %v470_v32 = vadd.f32 %v1185_v24, %v469_v30  ;;  %v1019_v33 = vpop.f32.mrb[2].mxu0  ;;  %v1035_v34 = vpop.f32.mrb[2].mxu1 }
  0xfc   : > { %v417_v35 = vadd.f32 %v1019_v33, %v1185_v24  ;;  %v481_v36 = vadd.f32 %v1035_v34, %v1185_v24  ;;  %v408_v37 = vpop.f32.mrb[3].mxu0  ;;  %v472_v38 = vpop.f32.mrb[3].mxu1  ;;  %v534_v41 = vmax.f32 %v414_v27, 0.0  ;;  %v550_v42 = vmax.f32 %v478_v28, 0.0 }
  0xfd   : > { %v409_v39 = vadd.f32 %v1185_v24, %v408_v37  ;;  %v473_v40 = vadd.f32 %v1185_v24, %v472_v38  ;;  %v532_v45 = vmax.f32 %v406_v31, 0.0  ;;  %v548_v46 = vmax.f32 %v470_v32, 0.0 }
  0xfe   : > { %v535_v43 = vmax.f32 %v417_v35, 0.0  ;;  %v551_v44 = vmax.f32 %v481_v36, 0.0 }
  0xff   : > { %v533_v47 = vmax.f32 %v409_v39, 0.0  ;;  %v549_v48 = vmax.f32 %v473_v40, 0.0 }
 0x100   : > { %v889_v49 = vpack.c.bf16 %v535_v43, %v534_v41  ;;  %v929_v50 = vpack.c.bf16 %v551_v44, %v550_v42 }
 0x101   : > { %v884_v51 = vpack.c.bf16 %v533_v47, %v532_v45  ;;  %v924_v52 = vpack.c.bf16 %v549_v48, %v548_v46  ;;  %v1022_v53 = vpop.f32.mrb[4].mxu0  ;;  %v1038_v54 = vpop.f32.mrb[4].mxu1 }
 0x102   : > { %961 = vst [vmem:[%s1200_s11 + $0x8] sm:$0xff] %v889_v49   ;;  %969 = vst [vmem:[%s1200_s11 + $0x48] sm:$0xff] %v929_v50   ;;  %v430_v55 = vadd.f32 %v1022_v53, %v1185_v24  ;;  %v494_v56 = vadd.f32 %v1038_v54, %v1185_v24  ;;  %v421_v57 = vpop.f32.mrb[5].mxu0  ;;  %v485_v58 = vpop.f32.mrb[5].mxu1 }
 0x103   : > { %885 = vst [vmem:[%s1200_s11] sm:$0xff] %v884_v51   ;;  %968 = vst [vmem:[%s1200_s11 + $0x40] sm:$0xff] %v924_v52   ;;  %v422_v59 = vadd.f32 %v1185_v24, %v421_v57  ;;  %v486_v60 = vadd.f32 %v1185_v24, %v485_v58  ;;  %v1023_v61 = vpop.f32.mrb[6].mxu0  ;;  %v1039_v62 = vpop.f32.mrb[6].mxu1 }
 0x104   : > { %v433_v63 = vadd.f32 %v1023_v61, %v1185_v24  ;;  %v497_v0 = vadd.f32 %v1039_v62, %v1185_v24  ;;  %v424_v1 = vpop.f32.mrb[7].mxu0  ;;  %v488_v2 = vpop.f32.mrb[7].mxu1  ;;  %v538_v5 = vmax.f32 %v430_v55, 0.0  ;;  %v554_v6 = vmax.f32 %v494_v56, 0.0 }
 0x105   : > { %v425_v3 = vadd.f32 %v1185_v24, %v424_v1  ;;  %v489_v4 = vadd.f32 %v1185_v24, %v488_v2  ;;  %v536_v9 = vmax.f32 %v422_v59, 0.0  ;;  %v552_v10 = vmax.f32 %v486_v60, 0.0 }
 0x106   : > { %v539_v7 = vmax.f32 %v433_v63, 0.0  ;;  %v555_v8 = vmax.f32 %v497_v0, 0.0 }
 0x107   : > { %v537_v11 = vmax.f32 %v425_v3, 0.0  ;;  %v553_v12 = vmax.f32 %v489_v4, 0.0 }
 0x108   : > { %v899_v13 = vpack.c.bf16 %v539_v7, %v538_v5  ;;  %v939_v14 = vpack.c.bf16 %v555_v8, %v554_v6 }
 0x109   : > { %v894_v15 = vpack.c.bf16 %v537_v11, %v536_v9  ;;  %v934_v16 = vpack.c.bf16 %v553_v12, %v552_v10  ;;  %v1026_v17 = vpop.f32.mrb[8].mxu0  ;;  %v1042_v18 = vpop.f32.mrb[8].mxu1 }
 0x10a   : > { %963 = vst [vmem:[%s1200_s11 + $0x18] sm:$0xff] %v899_v13   ;;  %971 = vst [vmem:[%s1200_s11 + $0x58] sm:$0xff] %v939_v14   ;;  %v446_v19 = vadd.f32 %v1026_v17, %v1185_v24  ;;  %v510_v20 = vadd.f32 %v1042_v18, %v1185_v24  ;;  %v437_v21 = vpop.f32.mrb[9].mxu0  ;;  %v501_v22 = vpop.f32.mrb[9].mxu1 }
 0x10b   : > { %962 = vst [vmem:[%s1200_s11 + $0x10] sm:$0xff] %v894_v15   ;;  %970 = vst [vmem:[%s1200_s11 + $0x50] sm:$0xff] %v934_v16   ;;  %v438_v23 = vadd.f32 %v1185_v24, %v437_v21  ;;  %v502_v25 = vadd.f32 %v1185_v24, %v501_v22  ;;  %v1027_v26 = vpop.f32.mrb[10].mxu0  ;;  %v1043_v27 = vpop.f32.mrb[10].mxu1 }
 0x10c   : > { %v449_v28 = vadd.f32 %v1027_v26, %v1185_v24  ;;  %v513_v29 = vadd.f32 %v1043_v27, %v1185_v24  ;;  %v440_v30 = vpop.f32.mrb[11].mxu0  ;;  %v504_v31 = vpop.f32.mrb[11].mxu1  ;;  %v542_v34 = vmax.f32 %v446_v19, 0.0  ;;  %v558_v35 = vmax.f32 %v510_v20, 0.0 }
 0x10d   : > { %v441_v32 = vadd.f32 %v1185_v24, %v440_v30  ;;  %v505_v33 = vadd.f32 %v1185_v24, %v504_v31  ;;  %v540_v38 = vmax.f32 %v438_v23, 0.0  ;;  %v556_v39 = vmax.f32 %v502_v25, 0.0 }
 0x10e   : > { %v543_v36 = vmax.f32 %v449_v28, 0.0  ;;  %v559_v37 = vmax.f32 %v513_v29, 0.0 }
 0x10f   : > { %v541_v40 = vmax.f32 %v441_v32, 0.0  ;;  %v557_v41 = vmax.f32 %v505_v33, 0.0 }
 0x110   : > { %v909_v42 = vpack.c.bf16 %v543_v36, %v542_v34  ;;  %v949_v43 = vpack.c.bf16 %v559_v37, %v558_v35 }
 0x111   : > { %v904_v44 = vpack.c.bf16 %v541_v40, %v540_v38  ;;  %v944_v45 = vpack.c.bf16 %v557_v41, %v556_v39  ;;  %v1030_v46 = vpop.f32.mrb[12].mxu0  ;;  %v1046_v47 = vpop.f32.mrb[12].mxu1 }
 0x112   : > { %965 = vst [vmem:[%s1200_s11 + $0x28] sm:$0xff] %v909_v42   ;;  %973 = vst [vmem:[%s1200_s11 + $0x68] sm:$0xff] %v949_v43   ;;  %v462_v48 = vadd.f32 %v1030_v46, %v1185_v24  ;;  %v526_v49 = vadd.f32 %v1046_v47, %v1185_v24  ;;  %v453_v50 = vpop.f32.mrb[13].mxu0  ;;  %v517_v51 = vpop.f32.mrb[13].mxu1 }
 0x113   : > { %964 = vst [vmem:[%s1200_s11 + $0x20] sm:$0xff] %v904_v44   ;;  %972 = vst [vmem:[%s1200_s11 + $0x60] sm:$0xff] %v944_v45   ;;  %v454_v52 = vadd.f32 %v1185_v24, %v453_v50  ;;  %v518_v53 = vadd.f32 %v1185_v24, %v517_v51  ;;  %v1031_v54 = vpop.f32.mrb[14].mxu0  ;;  %v1047_v55 = vpop.f32.mrb[14].mxu1 }
 0x114   : > { %v465_v56 = vadd.f32 %v1031_v54, %v1185_v24  ;;  %v529_v57 = vadd.f32 %v1047_v55, %v1185_v24  ;;  %v456_v58 = vpop.f32.mrb[15].mxu0  ;;  %v520_v59 = vpop.f32.mrb[15].mxu1  ;;  %v546_v62 = vmax.f32 %v462_v48, 0.0  ;;  %v562_v63 = vmax.f32 %v526_v49, 0.0 }
 0x115   : > { %v457_v60 = vadd.f32 %v1185_v24, %v456_v58  ;;  %v521_v61 = vadd.f32 %v1185_v24, %v520_v59  ;;  %v544_v2 = vmax.f32 %v454_v52, 0.0  ;;  %v560_v3 = vmax.f32 %v518_v53, 0.0 }
 0x116   : > { %v547_v0 = vmax.f32 %v465_v56, 0.0  ;;  %v563_v1 = vmax.f32 %v529_v57, 0.0 }
 0x117   : > { %v545_v4 = vmax.f32 %v457_v60, 0.0  ;;  %v561_v5 = vmax.f32 %v521_v61, 0.0 }
 0x118   : > { %v919_v6 = vpack.c.bf16 %v547_v0, %v546_v62  ;;  %v959_v7 = vpack.c.bf16 %v563_v1, %v562_v63 }
 0x119   : > { %v914_v8 = vpack.c.bf16 %v545_v4, %v544_v2  ;;  %v954_v9 = vpack.c.bf16 %v561_v5, %v560_v3 }
 0x11a   : > { %967 = vst [vmem:[%s1200_s11 + $0x38] sm:$0xff] %v919_v6   ;;  %975 = vst [vmem:[%s1200_s11 + $0x78] sm:$0xff] %v959_v7  }
 0x11b   : > { %966 = vst [vmem:[%s1200_s11 + $0x30] sm:$0xff] %v914_v8   ;;  %974 = vst [vmem:[%s1200_s11 + $0x70] sm:$0xff] %v954_v9  }
 0x11c PF: > { %s13_s12 = sadd.s32 1, %s1102_s12  }
 0x11d   : > { %p10_p4 = scmp.ge.s32.totalorder %s13_s12, 4  }
 0x11f   :  { %12 = sbr.rel (!%p10_p4) target bundleno = 1 (0x1), region = 62 }

// kernel: _lambda_.7
= control target key start
LH: loop header
LB: loop body
LE: loop exit
PB: predicated region body
PF: predicated region fallthrough
CT: control target
= control target key end

     0   :  { %s678_s15 = smov 0   ;;  %s736_s0 = inlined_call_operand.vmem [shape: bf16[2,8,8,128], index: 0, kind: input, shape index: {}]   ;;  %s737_s1 = inlined_call_operand.vmem [shape: bf16[1,128,128], index: 1, kind: input, shape index: {}]   ;;  %s738_s2 = inlined_call_operand.vmem [shape: f32[1,128], index: 2, kind: input, shape index: {}]   ;;  %s739_s3 = inlined_call_operand.vmem [shape: bf16[2,8,8,128], index: 3, kind: input, shape index: {}]   ;;  %s740_s4 = inlined_call_operand.vmem [shape: bf16[2,8,8,128], index: 4, kind: output, shape index: {}]  }
   0x1 LB: > { %s502_s16 = sadd.s32 4294967295, %s651_s15   ;;  %p506_p0 = scmp.ge.s32.totalorder %s651_s15, 1  ;;  %s651_s15 = sphi %s678_s15, %s14_s15  }
   0x2   : > { %p172_p1 = scmp.lt.s32.totalorder %s651_s15, 3 }
   0x4   : > { %p173_p2 = pnand %p506_p0, %p172_p1 }
   0x5   : > { %v633_v0 = vld [vmem:[%s737_s1] sm:$0xff] (!%p173_p2)   ;;  %p203_p3 = scmp.lt.s32.totalorder (!%p173_p2), %s502_s16, 1  ;;  %v634_v1 = vld [vmem:[%s737_s1 + $0x8] sm:$0xff] (!%p173_p2)   ;;  %v635_v2 = vld [vmem:[%s737_s1 + $0x10] sm:$0xff] (!%p173_p2)  }
   0x6   : > { %176 = sbr.rel (%p173_p2) target bundleno = 262 (0x106), region = 36  ;;  %585 = vmatprep.subr.bf16.mxu0 (!%p173_p2), %v633_v0  ;;  %609 = vmatprep.subr.bf16.mxu1 (!%p173_p2), %v633_v0  ;;  %v636_v3 = vld [vmem:[%s737_s1 + $0x18] sm:$0xff] (!%p173_p2)   ;;  %v637_v6 = vld [vmem:[%s737_s1 + $0x20] sm:$0xff] (!%p173_p2)   ;;  %v638_v7 = vld [vmem:[%s737_s1 + $0x28] sm:$0xff] (!%p173_p2)  }
   0x7   : > { %586 = vmatpush3.bf16.msra.mxu0 (!%p173_p2), %v633_v0  ;;  %617 = vmatpush3.bf16.msra.mxu1 (!%p173_p2), %v633_v0  ;;  %v639_v8 = vld [vmem:[%s737_s1 + $0x30] sm:$0xff] (!%p173_p2)   ;;  %v640_v9 = vld [vmem:[%s737_s1 + $0x38] sm:$0xff] (!%p173_p2)   ;;  %v513_v16 = vld [vmem:[%s738_s2] ss:$0 sm:$0xff] (!%p173_p2) }
   0x8   : > { %587 = vmatprep.subr.bf16.mxu0 (!%p173_p2), %v634_v1  ;;  %610 = vmatprep.subr.bf16.mxu1 (!%p173_p2), %v634_v1 }
   0xb   : > { %588 = vmatpush3.bf16.msra.mxu0 (!%p173_p2), %v634_v1  ;;  %618 = vmatpush3.bf16.msra.mxu1 (!%p173_p2), %v634_v1 }
   0xc   : > { %589 = vmatprep.subr.bf16.mxu0 (!%p173_p2), %v635_v2  ;;  %611 = vmatprep.subr.bf16.mxu1 (!%p173_p2), %v635_v2 }
   0xd   : > { %s742_s16 = smov (!%p203_p3, %s502_s16), 1 }
   0xe   : > { %s695_s23 = sshll.u32 %s742_s16, 5 }
   0xf   : > { %s701_s26 = scalar_lea.vmem %s736_s0, %s695_s23  ;;  %590 = vmatpush3.bf16.msra.mxu0 %v635_v2  ;;  %619 = vmatpush3.bf16.msra.mxu1 %v635_v2  ;;  %s212_s13 = scalar_lea.vmem %s739_s3, %s695_s23 }
  0x10   : > { %v641_v4 = vld [vmem:[%s701_s26] sm:$0xff]   ;;  %v642_v5 = vld [vmem:[%s701_s26 + $0x10] sm:$0xff]   ;;  %591 = vmatprep.subr.bf16.mxu0 %v636_v3  ;;  %612 = vmatprep.subr.bf16.mxu1 %v636_v3  ;;  %v643_v10 = vld [vmem:[%s701_s26 + $0x8] sm:$0xff]   ;;  %s217_s19 = scalar_lea.vmem %s740_s4, %s695_s23 }
  0x11   : > { %601 = vmatprep.mubr.bf16.mxu0 %v641_v4  ;;  %605 = vmatprep.mubr.bf16.mxu1 %v642_v5  ;;  %v644_v11 = vld [vmem:[%s701_s26 + $0x18] sm:$0xff]   ;;  %v567_v12 = vld [vmem:[%s212_s13 + $0x8] sm:$0xff]   ;;  %v532_v14 = vld [vmem:[%s212_s13] sm:$0xff]  }
  0x12   : > { %v569_v13 = vld [vmem:[%s212_s13 + $0x18] sm:$0xff]   ;;  %v568_v15 = vld [vmem:[%s212_s13 + $0x10] sm:$0xff]   ;;  %v537_v17 = vunpack.c.l.bf16 %v567_v12  ;;  %v533_v21 = vunpack.c.l.bf16 %v532_v14  ;;  %v538_v27 = vunpack.c.h.bf16 %v567_v12  ;;  %v534_v33 = vunpack.c.h.bf16 %v532_v14 }
  0x13   : > { %592 = vmatpush3.bf16.msra.mxu0 %v636_v3  ;;  %620 = vmatpush3.bf16.msra.mxu1 %v636_v3  ;;  %v545_v18 = vunpack.c.l.bf16 %v569_v13  ;;  %v541_v22 = vunpack.c.l.bf16 %v568_v15  ;;  %v546_v28 = vunpack.c.h.bf16 %v569_v13  ;;  %v542_v34 = vunpack.c.h.bf16 %v568_v15 }
  0x14   : > { %593 = vmatprep.subr.bf16.mxu0 %v637_v6  ;;  %613 = vmatprep.subr.bf16.mxu1 %v637_v6 }
  0x17   : > { %594 = vmatpush3.bf16.msra.mxu0 %v637_v6  ;;  %621 = vmatpush3.bf16.msra.mxu1 %v637_v6 }
  0x18   : > { %595 = vmatprep.subr.bf16.mxu0 %v638_v7  ;;  %614 = vmatprep.subr.bf16.mxu1 %v638_v7 }
  0x1b   : > { %596 = vmatpush3.bf16.msra.mxu0 %v638_v7  ;;  %622 = vmatpush3.bf16.msra.mxu1 %v638_v7 }
  0x1c   : > { %597 = vmatprep.subr.bf16.mxu0 %v639_v8  ;;  %615 = vmatprep.subr.bf16.mxu1 %v639_v8 }
  0x1f   : > { %598 = vmatpush3.bf16.msra.mxu0 %v639_v8  ;;  %623 = vmatpush3.bf16.msra.mxu1 %v639_v8 }
  0x20   : > { %599 = vmatprep.subr.bf16.mxu0 %v640_v9  ;;  %616 = vmatprep.subr.bf16.mxu1 %v640_v9 }
  0x23   : > { %600 = vmatpush3.bf16.msra.mxu0 %v640_v9  ;;  %624 = vmatpush3.bf16.msra.mxu1 %v640_v9 }
  0x26   : > { %602 = vmatmul.mubr.bf16.vlgmr.msra.gmra.mrb[0].mxu0 %v643_v10  ;;  %606 = vmatmul.mubr.bf16.vlgmr.msra.gmra.mrb[0].mxu1 %v644_v11 }
  0xf9   : > { %v603_v19 = vpop.f32.mrb[0].mxu0  ;;  %v607_v20 = vpop.f32.mrb[0].mxu1 }
  0xfa   : > { %v365_v23 = vadd.f32 %v603_v19, %v513_v16  ;;  %v381_v24 = vadd.f32 %v607_v20, %v513_v16  ;;  %v356_v25 = vpop.f32.mrb[1].mxu0  ;;  %v372_v26 = vpop.f32.mrb[1].mxu1 }
  0xfb   : > { %v357_v29 = vadd.f32 %v513_v16, %v356_v25  ;;  %v373_v30 = vadd.f32 %v513_v16, %v372_v26  ;;  %v604_v31 = vpop.f32.mrb[2].mxu0  ;;  %v608_v32 = vpop.f32.mrb[2].mxu1 }
  0xfc   : > { %v405_v35 = vadd.f32 %v537_v17, %v365_v23  ;;  %v409_v36 = vadd.f32 %v545_v18, %v381_v24  ;;  %v368_v37 = vadd.f32 %v604_v31, %v513_v16  ;;  %v384_v38 = vadd.f32 %v608_v32, %v513_v16  ;;  %v359_v39 = vpop.f32.mrb[3].mxu0  ;;  %v375_v40 = vpop.f32.mrb[3].mxu1 }
  0xfd   : > { %v403_v41 = vadd.f32 %v533_v21, %v357_v29  ;;  %v407_v42 = vadd.f32 %v541_v22, %v373_v30  ;;  %v360_v43 = vadd.f32 %v513_v16, %v359_v39  ;;  %v376_v44 = vadd.f32 %v513_v16, %v375_v40 }
  0xfe   : > { %v406_v45 = vadd.f32 %v538_v27, %v368_v37  ;;  %v410_v46 = vadd.f32 %v546_v28, %v384_v38  ;;  %v413_v49 = vmax.f32 %v405_v35, 0.0  ;;  %v417_v50 = vmax.f32 %v409_v36, 0.0 }
  0xff   : > { %v404_v47 = vadd.f32 %v534_v33, %v360_v43  ;;  %v408_v48 = vadd.f32 %v542_v34, %v376_v44  ;;  %v411_v53 = vmax.f32 %v403_v41, 0.0  ;;  %v415_v54 = vmax.f32 %v407_v42, 0.0 }
 0x100   : > { %v414_v51 = vmax.f32 %v406_v45, 0.0  ;;  %v418_v52 = vmax.f32 %v410_v46, 0.0 }
 0x101   : > { %v412_v55 = vmax.f32 %v404_v47, 0.0  ;;  %v416_v56 = vmax.f32 %v408_v48, 0.0 }
 0x102   : > { %v555_v57 = vpack.c.bf16 %v414_v51, %v413_v49  ;;  %v565_v58 = vpack.c.bf16 %v418_v52, %v417_v50 }
 0x103   : > { %v550_v59 = vpack.c.bf16 %v412_v55, %v411_v53  ;;  %v560_v60 = vpack.c.bf16 %v416_v56, %v415_v54 }
 0x104   : > { %570 = vst [vmem:[%s217_s19 + $0x8] sm:$0xff] %v555_v57   ;;  %572 = vst [vmem:[%s217_s19 + $0x18] sm:$0xff] %v565_v58  }
 0x105   : > { %551 = vst [vmem:[%s217_s19] sm:$0xff] %v550_v59   ;;  %571 = vst [vmem:[%s217_s19 + $0x10] sm:$0xff] %v560_v60  }
 0x106 PF: > { %s14_s15 = sadd.s32 1, %s651_s15  }
 0x107   : > { %p11_p4 = scmp.ge.s32.totalorder %s14_s15, 4  }
 0x109   :  { %13 = sbr.rel (!%p11_p4) target bundleno = 1 (0x1), region = 69 }

// kernel: _lambda_.5
= control target key start
LH: loop header
LB: loop body
LE: loop exit
PB: predicated region body
PF: predicated region fallthrough
CT: control target
= control target key end

     0   :  { %s2968_s12 = smov 0   ;;  %s3366_s0 = inlined_call_operand.vmem [shape: bf16[2,9,2,9,256], index: 0, kind: input, shape index: {}]   ;;  %s3367_s1 = inlined_call_operand.vmem [shape: bf16[9,128,128], index: 1, kind: input, shape index: {}]   ;;  %s3368_s2 = inlined_call_operand.vmem [shape: f32[1,128], index: 2, kind: input, shape index: {}]   ;;  %s3369_s3 = inlined_call_operand.vmem [shape: bf16[2,8,8,128], index: 3, kind: output, shape index: {}]  }
   0x1 LB: > { %s2120_s13 = sadd.s32 4294967295, %s2946_s12   ;;  %p2124_p0 = scmp.ge.s32.totalorder %s2946_s12, 1  ;;  %s2946_s12 = sphi %s2968_s12, %s13_s12  }
   0x2   : > { %p137_p1 = scmp.lt.s32.totalorder %s2946_s12, 3 }
   0x4   : > { %p138_p2 = pnand %p2124_p0, %p137_p1 }
   0x5   : > { %v2868_v0 = vld [vmem:[%s3367_s1 + $0x40] sm:$0xff] (!%p138_p2)   ;;  %p161_p3 = scmp.lt.s32.totalorder (!%p138_p2), %s2120_s13, 1  ;;  %v2870_v2 = vld [vmem:[%s3367_s1 + $0x48] sm:$0xff] (!%p138_p2)   ;;  %v2872_v4 = vld [vmem:[%s3367_s1 + $0x50] sm:$0xff] (!%p138_p2)   ;;  %vm511_vm0 = vsmask.f32 (!%p138_p2), 3328 }
   0x6   : > { %141 = sbr.rel (%p138_p2) target bundleno = 391 (0x187), region = 32  ;;  %v2869_v1 = vld [vmem:[%s3367_s1 + $0x100] sm:$0xff] (!%p138_p2)   ;;  %2563 = vmatprep.subr.bf16.mxu1 (!%p138_p2), %v2868_v0  ;;  %v2871_v3 = vld [vmem:[%s3367_s1 + $0x108] sm:$0xff] (!%p138_p2)   ;;  %v2873_v5 = vld [vmem:[%s3367_s1 + $0x110] sm:$0xff] (!%p138_p2)   ;;  %vm512_vm1 = vsmask.f32 (!%p138_p2), 7440 }
   0x7   : > { %2659 = vmatprep.subr.bf16.mxu0 (!%p138_p2), %v2869_v1  ;;  %2564 = vmatpush3.bf16.msra.mxu1 (!%p138_p2), %v2868_v0  ;;  %v2874_v6 = vld [vmem:[%s3367_s1 + $0x58] sm:$0xff] (!%p138_p2)   ;;  %v2876_v8 = vld [vmem:[%s3367_s1 + $0x60] sm:$0xff] (!%p138_p2)   ;;  %v2878_v10 = vld [vmem:[%s3367_s1 + $0x68] sm:$0xff] (!%p138_p2)  }
   0x8   : > { %2660 = vmatpush3.bf16.msra.mxu0 (!%p138_p2), %v2869_v1  ;;  %2565 = vmatprep.subr.bf16.mxu1 (!%p138_p2), %v2870_v2  ;;  %v2875_v7 = vld [vmem:[%s3367_s1 + $0x118] sm:$0xff] (!%p138_p2)   ;;  %v2877_v9 = vld [vmem:[%s3367_s1 + $0x120] sm:$0xff] (!%p138_p2)   ;;  %v2879_v13 = vld [vmem:[%s3367_s1 + $0x128] sm:$0xff] (!%p138_p2)  }
   0x9   : > { %2661 = vmatprep.subr.bf16.mxu0 (!%p138_p2), %v2871_v3  ;;  %v2880_v18 = vld [vmem:[%s3367_s1 + $0x70] sm:$0xff] (!%p138_p2)   ;;  %v2882_v20 = vld [vmem:[%s3367_s1 + $0x78] sm:$0xff] (!%p138_p2)   ;;  %v2884_v23 = vld [vmem:[%s3367_s1] sm:$0xff] (!%p138_p2)  }
   0xa   : > { %v2881_v19 = vld [vmem:[%s3367_s1 + $0x130] sm:$0xff] (!%p138_p2)   ;;  %v2883_v21 = vld [vmem:[%s3367_s1 + $0x138] sm:$0xff] (!%p138_p2)   ;;  %v2885_v27 = vld [vmem:[%s3367_s1 + $0x140] sm:$0xff] (!%p138_p2)  }
   0xb   : > { %2566 = vmatpush3.bf16.msra.mxu1 (!%p138_p2), %v2870_v2  ;;  %v2886_v32 = vld [vmem:[%s3367_s1 + $0x8] sm:$0xff] (!%p138_p2)   ;;  %v2888_v37 = vld [vmem:[%s3367_s1 + $0x10] sm:$0xff] (!%p138_p2)   ;;  %v2890_v45 = vld [vmem:[%s3367_s1 + $0x18] sm:$0xff] (!%p138_p2)  }
   0xc   : > { %2662 = vmatpush3.bf16.msra.mxu0 (!%p138_p2), %v2871_v3  ;;  %2567 = vmatprep.subr.bf16.mxu1 (!%p138_p2), %v2872_v4  ;;  %v2887_v35 = vld [vmem:[%s3367_s1 + $0x148] sm:$0xff] (!%p138_p2)   ;;  %v2889_v43 = vld [vmem:[%s3367_s1 + $0x150] sm:$0xff] (!%p138_p2)   ;;  %v2891_v54 = vld [vmem:[%s3367_s1 + $0x158] sm:$0xff] (!%p138_p2)  }
   0xd   : > { %s3373_s13 = smov (!%p161_p3, %s2120_s13), 1  ;;  %2663 = vmatprep.subr.bf16.mxu0 %v2873_v5  ;;  %v2892_v1 = vld [vmem:[%s3367_s1 + $0x20] sm:$0xff]   ;;  %vm3086_vm2 = vmor %vm511_vm0, %vm512_vm1 }
   0xe   : > { %s2859_s30 = smul.u32 288, %s3373_s13  ;;  %v2893_v2 = vld [vmem:[%s3367_s1 + $0x160] sm:$0xff]   ;;  %s2431_s18 = sshll.u32 %s3373_s13, 5 }
   0xf   : > { %2568 = vmatpush3.bf16.msra.mxu1 %v2872_v4  ;;  %s170_s21 = scalar_lea.vmem %s3369_s3, %s2431_s18 }
  0x10   : > { %2664 = vmatpush3.bf16.msra.mxu0 %v2873_v5  ;;  %2569 = vmatprep.subr.bf16.mxu1 %v2874_v6  ;;  %s3012_s10 = scalar_lea.vmem %s3366_s0, %s2859_s30 }
  0x11   : > { %2665 = vmatprep.subr.bf16.mxu0 %v2875_v7  ;;  %v196_v11 = vld [vmem:[%s3012_s10 + $0x4] sm:$0xf]  ;;  %v2232_v15 = vld [vmem:[%s3012_s10 + $0x14] sm:$0xf]  ;;  %v172_v44 = vld [vmem:[%s3012_s10] sm:$0xf] }
  0x12   : > { %v197_v12 = vld [vmem:[%s3012_s10 + $0x24] sm:$0xf]  ;;  %v2233_v16 = vld [vmem:[%s3012_s10 + $0x34] sm:$0xf]  ;;  %v173_v47 = vld [vmem:[%s3012_s10 + $0x20] sm:$0xf] }
  0x13   : > { %2570 = vmatpush3.bf16.msra.mxu1 %v2874_v6  ;;  %v2144_v14 = vcombine.low %v196_v11, %v197_v12  ;;  %v2256_v17 = vcombine.low %v2232_v15, %v2233_v16  ;;  %v198_v22 = vld [vmem:[%s3012_s10 + $0x44] sm:$0xf]  ;;  %v2234_v25 = vld [vmem:[%s3012_s10 + $0x54] sm:$0xf]  ;;  %v2268_v49 = vld [vmem:[%s3012_s10 + $0x10] sm:$0xf]  ;;  %v2156_v55 = vcombine.low %v172_v44, %v173_v47 }
  0x14   : > { %2666 = vmatpush3.bf16.msra.mxu0 %v2875_v7  ;;  %2571 = vmatprep.subr.bf16.mxu1 %v2876_v8  ;;  %v199_v24 = vld [vmem:[%s3012_s10 + $0x64] sm:$0xf]  ;;  %v2235_v26 = vld [vmem:[%s3012_s10 + $0x74] sm:$0xf]  ;;  %v2269_v50 = vld [vmem:[%s3012_s10 + $0x18] sm:$0x1] }
  0x15   : > { %2667 = vmatprep.subr.bf16.mxu0 %v2877_v9  ;;  %2579 = vmatprep.mubr.bf16.mxu1 %v2144_v14  ;;  %v2145_v28 = vcombine.low %v198_v22, %v199_v24  ;;  %v200_v29 = vld [vmem:[%s3012_s10 + $0x84] sm:$0xf]  ;;  %v2257_v30 = vcombine.low %v2234_v25, %v2235_v26  ;;  %v2236_v33 = vld [vmem:[%s3012_s10 + $0x94] sm:$0xf]  ;;  %v2270_v51 = vld [vmem:[%s3012_s10 + $0x30] sm:$0xf] }
  0x16   : > { %2675 = vmatprep.mubr.bf16.mxu0 %v2256_v17  ;;  %v201_v31 = vld [vmem:[%s3012_s10 + $0xa4] sm:$0xf]  ;;  %v2237_v34 = vld [vmem:[%s3012_s10 + $0xb4] sm:$0xf]  ;;  %v1138_v52 = vshrl.u32 %v2268_v49, 16  ;;  %v1141_v53 = vshll.u32 %v2268_v49, 16 }
  0x17   : > { %2572 = vmatpush3.bf16.msra.mxu1 %v2876_v8  ;;  %v2146_v36 = vcombine.low %v200_v29, %v201_v31  ;;  %v2258_v38 = vcombine.low %v2236_v33, %v2237_v34  ;;  %v202_v39 = vld [vmem:[%s3012_s10 + $0xc4] sm:$0xf]  ;;  %v2238_v41 = vld [vmem:[%s3012_s10 + $0xd4] sm:$0xf]  ;;  %v2271_v56 = vld [vmem:[%s3012_s10 + $0x38] sm:$0x1] }
  0x18   : > { %2668 = vmatpush3.bf16.msra.mxu0 %v2877_v9  ;;  %2573 = vmatprep.subr.bf16.mxu1 %v2878_v10  ;;  %v203_v40 = vld [vmem:[%s3012_s10 + $0xe4] sm:$0xf]  ;;  %v2239_v42 = vld [vmem:[%s3012_s10 + $0xf4] sm:$0xf]  ;;  %v1147_v57 = vshll.u32 %v2269_v50, 16  ;;  %v1152_v58 = vshrl.u32 %v2270_v51, 16 }
  0x19   : > { %2669 = vmatprep.subr.bf16.mxu0 %v2879_v13  ;;  %v2147_v46 = vcombine.low %v202_v39, %v203_v40  ;;  %v2259_v48 = vcombine.low %v2238_v41, %v2239_v42  ;;  %v1155_v59 = vshll.u32 %v2270_v51, 16  ;;  %v1140_v60 = vrot.slane %v1138_v52, 4  ;;  %v2272_v8 = vld [vmem:[%s3012_s10 + $0x50] sm:$0xf]  ;;  %v2273_v9 = vld [vmem:[%s3012_s10 + $0x58] sm:$0x1] }
  0x1a   : > { %v1143_v61 = vrot.slane %v1141_v53, 5  ;;  %v1161_v62 = vshll.u32 %v2271_v56, 16  ;;  %v1154_v63 = vrot.slane %v1152_v58, 4  ;;  %v1149_v5 = vrot.slane %v1147_v57, 5  ;;  %v2275_v12 = vld [vmem:[%s3012_s10 + $0x78] sm:$0x1] }
  0x1b   : > { %2574 = vmatpush3.bf16.msra.mxu1 %v2878_v10  ;;  %v1157_v0 = vrot.slane %v1155_v59, 5  ;;  %v2274_v10 = vld [vmem:[%s3012_s10 + $0x70] sm:$0xf]  ;;  %v1169_v14 = vshll.u32 %v2272_v8, 16  ;;  %v1175_v22 = vshll.u32 %v2273_v9, 16  ;;  %v2900_v40 = vld [vmem:[%s3367_s1 + $0x80] sm:$0xff]  }
  0x1c   : > { %2670 = vmatpush3.bf16.msra.mxu0 %v2879_v13  ;;  %2575 = vmatprep.subr.bf16.mxu1 %v2880_v18  ;;  %v1144_v4 = vor.u32 %v1143_v61, %v1140_v60  ;;  %v1163_v6 = vrot.slane %v1161_v62, 5  ;;  %v1166_v13 = vshrl.u32 %v2272_v8, 16  ;;  %v1180_v16 = vshrl.u32 %v2274_v10, 16  ;;  %v174_v39 = vld [vmem:[%s3012_s10 + $0x40] sm:$0xf]  ;;  %v2902_v62 = vld [vmem:[%s3367_s1 + $0x88] sm:$0xff]  }
  0x1d   : > { %2671 = vmatprep.subr.bf16.mxu0 %v2881_v19  ;;  %v1158_v7 = vor.u32 %v1157_v0, %v1154_v63  ;;  %v1183_v17 = vshll.u32 %v2274_v10, 16  ;;  %v1177_v33 = vrot.slane %v1175_v22, 5  ;;  %v175_v41 = vld [vmem:[%s3012_s10 + $0x60] sm:$0xf]  ;;  %v2276_v47 = vld [vmem:[%s3012_s10 + $0x90] sm:$0xf] }
  0x1e   : > { %v1145_v11 = vrot.slane %v1144_v4, 4  ;;  %v1182_v25 = vrot.slane %v1180_v16, 4  ;;  %v2901_v42 = vld [vmem:[%s3367_s1 + $0x180] sm:$0xff]   ;;  %v2278_v49 = vld [vmem:[%s3012_s10 + $0xb0] sm:$0xf]  ;;  %v1194_v51 = vshrl.u32 %v2276_v47, 16  ;;  %v2157_v57 = vcombine.low %v174_v39, %v175_v41 }
  0x1f   : > { %2576 = vmatpush3.bf16.msra.mxu1 %v2880_v18  ;;  %v1159_v15 = vrot.slane %v1158_v7, 4  ;;  %v2894_v18 = vld [vmem:[%s3367_s1 + $0x28] sm:$0xff]   ;;  %v1185_v26 = vrot.slane %v1183_v17, 5  ;;  %v2279_v50 = vld [vmem:[%s3012_s10 + $0xb8] sm:$0x1]  ;;  %v1197_v52 = vshll.u32 %v2276_v47, 16 }
  0x20   : > { %2672 = vmatpush3.bf16.msra.mxu0 %v2881_v19  ;;  %2577 = vmatprep.subr.bf16.mxu1 %v2882_v20  ;;  %v1150_v19 = vsel %vm3086_vm2, %v1145_v11, %v1149_v5  ;;  %v1217_v56 = vshll.u32 %v2279_v50, 16  ;;  %v1196_v58 = vrot.slane %v1194_v51, 4  ;;  %v3138_v5 = vld [vmem:[%s3012_s10 + $0xc0] sm:$0xf]  ;;  %v2280_v7 = vld [vmem:[%s3012_s10 + $0xd0] sm:$0xf] }
  0x21   : > { %2673 = vmatprep.subr.bf16.mxu0 %v2883_v21  ;;  %v1164_v24 = vsel %vm3086_vm2, %v1159_v15, %v1163_v6  ;;  %v1186_v31 = vor.u32 %v1185_v26, %v1182_v25  ;;  %v1199_v59 = vrot.slane %v1197_v52, 5  ;;  %v179_v6 = vld [vmem:[%s3012_s10 + $0xe0] sm:$0xf]  ;;  %v2281_v8 = vld [vmem:[%s3012_s10 + $0xd8] sm:$0x1]  ;;  %v2903_v10 = vld [vmem:[%s3367_s1 + $0x188] sm:$0xff]  }
  0x22   : > { %v2300_v29 = vcombine.low %v1150_v19, %v1164_v24  ;;  %v2282_v9 = vld [vmem:[%s3012_s10 + $0xf0] sm:$0xf]  ;;  %v1231_v15 = vshll.u32 %v2281_v8, 16  ;;  %v498_v39 = vld [vmem:[%s3012_s10 + $0x28] sm:$0x1]  ;;  %v2907_v50 = vld [vmem:[%s3367_s1 + $0x198] sm:$0xff]  }
  0x23   : > { %2578 = vmatpush3.bf16.msra.mxu1 %v2882_v20  ;;  %v1168_v20 = vrot.slane %v1166_v13, 4  ;;  %v1200_v4 = vor.u32 %v1199_v59, %v1196_v58  ;;  %v1222_v13 = vshrl.u32 %v2280_v7, 16  ;;  %v2904_v16 = vld [vmem:[%s3367_s1 + $0x90] sm:$0xff]   ;;  %v1239_v19 = vshll.u32 %v2282_v9, 16  ;;  %v2313_v58 = vld [vmem:[%s3012_s10 + $0x40] sm:$0xf] }
  0x24   : > { %2674 = vmatpush3.bf16.msra.mxu0 %v2883_v21  ;;  %2587 = vmatprep.subr.bf16.mxu1 %v2884_v23  ;;  %v1171_v21 = vrot.slane %v1169_v14, 5  ;;  %v1225_v14 = vshll.u32 %v2280_v7, 16  ;;  %v1233_v24 = vrot.slane %v1231_v15, 5  ;;  %v2905_v25 = vld [vmem:[%s3367_s1 + $0x190] sm:$0xff]   ;;  %v2908_v59 = vld [vmem:[%s3367_s1 + $0xa0] sm:$0xff]   ;;  %v2911_v15 = vld [vmem:[%s3367_s1 + $0x1a8] sm:$0xff]  }
  0x25   : > { %2683 = vmatprep.subr.bf16.mxu0 %v2885_v27  ;;  %v1201_v17 = vrot.slane %v1200_v4, 4  ;;  %v1224_v22 = vrot.slane %v1222_v13, 4  ;;  %v501_v4 = vld [vmem:[%s3012_s10 + $0x60] sm:$0xf]  ;;  %v502_v8 = vld [vmem:[%s3012_s10 + $0x68] sm:$0x1] }
  0x26   : > { %2580 = vmatmul.mubr.bf16.vlgmr.msra.gmra.mrb[0].mxu1 %v2145_v28  ;;  %v2896_v28 = vld [vmem:[%s3367_s1 + $0x30] sm:$0xff]  }
  0x27   : > { %2588 = vmatpush3.bf16.msra.mxu1 %v2884_v23  ;;  %2676 = vmatmul.mubr.bf16.vlgmr.msra.gmra.mrb[0].mxu0 %v2257_v30  ;;  %v2895_v23 = vld [vmem:[%s3367_s1 + $0x168] sm:$0xff]   ;;  %v1172_v30 = vor.u32 %v1171_v21, %v1168_v20 }
  0x28   : > { %2684 = vmatpush3.bf16.msra.mxu0 %v2885_v27  ;;  %2589 = vmatprep.subr.bf16.mxu1 %v2886_v32  ;;  %v1189_v27 = vshll.u32 %v2275_v12, 16  ;;  %v2283_v12 = vld [vmem:[%s3012_s10 + $0xf8] sm:$0x1] }
  0x29   : > { %2685 = vmatprep.subr.bf16.mxu0 %v2887_v35  ;;  %2583 = vmatprep.mubr.bf16.mxu1 %v2146_v36  ;;  %v1187_v36 = vrot.slane %v1186_v31, 4  ;;  %v1245_v20 = vshll.u32 %v2283_v12, 16  ;;  %v2159_v31 = vcombine.low %v3138_v5, %v179_v6  ;;  %v2909_v6 = vld [vmem:[%s3367_s1 + $0x1a0] sm:$0xff]  }
  0x2a   : > { %2679 = vmatprep.mubr.bf16.mxu0 %v2258_v38  ;;  %v1191_v34 = vrot.slane %v1189_v27, 5  ;;  %v2899_v38 = vld [vmem:[%s3367_s1 + $0x178] sm:$0xff]  }
  0x2b   : > { %2590 = vmatpush3.bf16.msra.mxu1 %v2886_v32  ;;  %v2897_v32 = vld [vmem:[%s3367_s1 + $0x170] sm:$0xff]  }
  0x2c   : > { %2686 = vmatpush3.bf16.msra.mxu0 %v2887_v35  ;;  %2591 = vmatprep.subr.bf16.mxu1 %v2888_v37  ;;  %v1173_v35 = vrot.slane %v1172_v30, 4  ;;  %v1192_v44 = vsel %vm3086_vm2, %v1187_v36, %v1191_v34  ;;  %v496_v34 = vld [vmem:[%s3012_s10 + $0x8] sm:$0x1] }
  0x2d   : > { %2687 = vmatprep.subr.bf16.mxu0 %v2889_v43 }
  0x2e   : > { %2584 = vmatmul.mubr.bf16.gmra.mrb[4].mxu1 %v2147_v46  ;;  %v177_v46 = vld [vmem:[%s3012_s10 + $0xa0] sm:$0xf] }
  0x2f   : > { %2592 = vmatpush3.bf16.msra.mxu1 %v2888_v37  ;;  %2680 = vmatmul.mubr.bf16.gmra.mrb[4].mxu0 %v2259_v48  ;;  %v2898_v37 = vld [vmem:[%s3367_s1 + $0x38] sm:$0xff]  }
  0x30   : > { %2688 = vmatpush3.bf16.msra.mxu0 %v2889_v43  ;;  %2593 = vmatprep.subr.bf16.mxu1 %v2890_v45  ;;  %v1178_v43 = vsel %vm3086_vm2, %v1173_v35, %v1177_v33  ;;  %v2277_v48 = vld [vmem:[%s3012_s10 + $0x98] sm:$0x1]  ;;  %v495_v33 = vld [vmem:[%s3012_s10] sm:$0xf] }
  0x31   : > { %2689 = vmatprep.subr.bf16.mxu0 %v2891_v54  ;;  %2603 = vmatprep.mubr.bf16.mxu1 %v2156_v55  ;;  %v1203_v53 = vshll.u32 %v2277_v48, 16  ;;  %v1211_v55 = vshll.u32 %v2278_v49, 16  ;;  %v2301_v61 = vcombine.low %v1178_v43, %v1192_v44  ;;  %v2906_v35 = vld [vmem:[%s3367_s1 + $0x98] sm:$0xff]   ;;  %v518_v41 = vshll.u32 %v495_v33, 16 }
  0x32   : > { %2699 = vmatprep.mubr.bf16.mxu0 %v2300_v29  ;;  %v1247_v29 = vrot.slane %v1245_v20, 5  ;;  %v524_v43 = vshll.u32 %v496_v34, 16  ;;  %v2315_v34 = vld [vmem:[%s3012_s10 + $0x80] sm:$0xf] }
  0x33   : > { %2594 = vmatpush3.bf16.msra.mxu1 %v2890_v45  ;;  %v176_v45 = vld [vmem:[%s3012_s10 + $0x80] sm:$0xf]  ;;  %v1205_v63 = vrot.slane %v1203_v53, 5  ;;  %v1213_v0 = vrot.slane %v1211_v55, 5  ;;  %v520_v48 = vrot.slane %v518_v41, 5 }
  0x34   : > { %2690 = vmatpush3.bf16.msra.mxu0 %v2891_v54  ;;  %2595 = vmatprep.subr.bf16.mxu1 %v2892_v1  ;;  %v1208_v54 = vshrl.u32 %v2278_v49, 16  ;;  %v538_v49 = vshll.u32 %v498_v39, 16  ;;  %v505_v39 = vld [vmem:[%s3012_s10 + $0xa0] sm:$0xf]  ;;  %v506_v41 = vld [vmem:[%s3012_s10 + $0xa8] sm:$0x1] }
  0x35   : > { %2691 = vmatprep.subr.bf16.mxu0 %v2893_v2  ;;  %v1206_v26 = vsel %vm3086_vm2, %v1201_v17, %v1205_v63 }
  0x36   : > { %v1210_v60 = vrot.slane %v1208_v54, 4  ;;  %v2312_v54 = vld [vmem:[%s3012_s10 + $0x20] sm:$0xf] }
  0x37   : > { %2596 = vmatpush3.bf16.msra.mxu1 %v2892_v1  ;;  %v1219_v1 = vrot.slane %v1217_v56, 5  ;;  %v2336_v63 = vcombine.low %v2312_v54, %v2313_v58 }
  0x38   : > { %2692 = vmatpush3.bf16.msra.mxu0 %v2893_v2  ;;  %2597 = vmatprep.subr.bf16.mxu1 %v2894_v18  ;;  %v2158_v2 = vcombine.low %v176_v45, %v177_v46  ;;  %v1214_v11 = vor.u32 %v1213_v0, %v1210_v60  ;;  %v499_v0 = vld [vmem:[%s3012_s10 + $0x40] sm:$0xf] }
  0x39   : > { %2693 = vmatprep.subr.bf16.mxu0 %v2895_v23  ;;  %v543_v5 = vshrl.u32 %v499_v0, 16 }
  0x3a   : > { %v1215_v21 = vrot.slane %v1214_v11, 4  ;;  %v2910_v11 = vld [vmem:[%s3367_s1 + $0xa8] sm:$0xff]  }
  0x3b   : > { %2598 = vmatpush3.bf16.msra.mxu1 %v2894_v18  ;;  %v1236_v18 = vshrl.u32 %v2282_v9, 16  ;;  %v546_v9 = vshll.u32 %v499_v0, 16  ;;  %v545_v13 = vrot.slane %v543_v5, 4  ;;  %v510_v0 = vld [vmem:[%s3012_s10 + $0xe8] sm:$0x1] }
  0x3c   : > { %2694 = vmatpush3.bf16.msra.mxu0 %v2895_v23  ;;  %2599 = vmatprep.subr.bf16.mxu1 %v2896_v28  ;;  %v1227_v23 = vrot.slane %v1225_v14, 5  ;;  %v1220_v30 = vsel %vm3086_vm2, %v1215_v21, %v1219_v1  ;;  %v560_v14 = vshll.u32 %v501_v4, 16  ;;  %v2918_v5 = vld [vmem:[%s3367_s1 + $0xc8] sm:$0xff]  }
  0x3d   : > { %2695 = vmatprep.subr.bf16.mxu0 %v2897_v32  ;;  %v1238_v27 = vrot.slane %v1236_v18, 4  ;;  %v2302_v36 = vcombine.low %v1206_v26, %v1220_v30  ;;  %v548_v17 = vrot.slane %v546_v9, 5  ;;  %v2913_v26 = vld [vmem:[%s3367_s1 + $0x1b0] sm:$0xff]   ;;  %v622_v9 = vshll.u32 %v510_v0, 16  ;;  %v2350_v0 = vld [vmem:[%s3012_s10 + $0x64] sm:$0xf] }
  0x3e   : > { %v562_v21 = vrot.slane %v560_v14, 5  ;;  %v2919_v14 = vld [vmem:[%s3367_s1 + $0x1c8] sm:$0xff]  }
  0x3f   : > { %2600 = vmatpush3.bf16.msra.mxu1 %v2896_v28  ;;  %v1241_v28 = vrot.slane %v1239_v19, 5 }
  0x40   : > { %2696 = vmatpush3.bf16.msra.mxu0 %v2897_v32  ;;  %2601 = vmatprep.subr.bf16.mxu1 %v2898_v37  ;;  %v1228_v32 = vor.u32 %v1227_v23, %v1224_v22  ;;  %v566_v22 = vshll.u32 %v502_v8, 16  ;;  %v549_v23 = vor.u32 %v548_v17, %v545_v13 }
  0x41   : > { %2697 = vmatprep.subr.bf16.mxu0 %v2899_v38 }
  0x43   : > { %2602 = vmatpush3.bf16.msra.mxu1 %v2898_v37  ;;  %v1242_v37 = vor.u32 %v1241_v28, %v1238_v27  ;;  %v568_v28 = vrot.slane %v566_v22, 5 }
  0x44   : > { %2698 = vmatpush3.bf16.msra.mxu0 %v2899_v38  ;;  %2611 = vmatprep.subr.bf16.mxu1 %v2900_v40  ;;  %v497_v38 = vld [vmem:[%s3012_s10 + $0x20] sm:$0xf] }
  0x45   : > { %2707 = vmatprep.subr.bf16.mxu0 %v2901_v42  ;;  %v529_v44 = vshrl.u32 %v497_v38, 16  ;;  %v532_v45 = vshll.u32 %v497_v38, 16  ;;  %v1243_v46 = vrot.slane %v1242_v37, 4  ;;  %v503_v37 = vld [vmem:[%s3012_s10 + $0x80] sm:$0xf] }
  0x46   : > { %2604 = vmatmul.mubr.bf16.vlgmr.msra.gmra.mrb[0].mxu1 %v2157_v57  ;;  %v526_v57 = vrot.slane %v524_v43, 5  ;;  %v504_v38 = vld [vmem:[%s3012_s10 + $0x88] sm:$0x1]  ;;  %v574_v43 = vshll.u32 %v503_v37, 16 }
  0x47   : > { %2612 = vmatpush3.bf16.msra.mxu1 %v2900_v40  ;;  %2700 = vmatmul.mubr.bf16.vlgmr.msra.gmra.mrb[0].mxu0 %v2301_v61  ;;  %v515_v40 = vshrl.u32 %v495_v33, 16  ;;  %v531_v52 = vrot.slane %v529_v44, 4  ;;  %v534_v53 = vrot.slane %v532_v45, 5  ;;  %v1248_v55 = vsel %vm3086_vm2, %v1243_v46, %v1247_v29  ;;  %v3208_v33 = vld [vmem:[%s3012_s10 + $0x60] sm:$0xf] }
  0x48   : > { %2708 = vmatpush3.bf16.msra.mxu0 %v2901_v42  ;;  %2613 = vmatprep.subr.bf16.mxu1 %v2902_v62  ;;  %v1229_v42 = vrot.slane %v1228_v32, 4  ;;  %v550_v29 = vrot.slane %v549_v23, 4  ;;  %v2915_v32 = vld [vmem:[%s3367_s1 + $0x1b8] sm:$0xff]   ;;  %v580_v44 = vshll.u32 %v504_v38, 16  ;;  %v585_v45 = vshrl.u32 %v505_v39, 16  ;;  %v2917_v46 = vld [vmem:[%s3367_s1 + $0x1c0] sm:$0xff]  }
  0x49   : > { %2709 = vmatprep.subr.bf16.mxu0 %v2903_v10  ;;  %2607 = vmatprep.mubr.bf16.mxu1 %v2158_v2  ;;  %v517_v47 = vrot.slane %v515_v40, 4  ;;  %v535_v61 = vor.u32 %v534_v53, %v531_v52  ;;  %v500_v2 = vld [vmem:[%s3012_s10 + $0x48] sm:$0x1]  ;;  %v2916_v40 = vld [vmem:[%s3367_s1 + $0xc0] sm:$0xff]   ;;  %v576_v53 = vrot.slane %v574_v43, 5 }
  0x4a   : > { %2703 = vmatprep.mubr.bf16.mxu0 %v2302_v36  ;;  %v1234_v51 = vsel %vm3086_vm2, %v1229_v42, %v1233_v24  ;;  %v552_v18 = vshll.u32 %v500_v2, 16  ;;  %v2912_v24 = vld [vmem:[%s3367_s1 + $0xb0] sm:$0xff]   ;;  %v571_v42 = vshrl.u32 %v503_v37, 16  ;;  %v582_v54 = vrot.slane %v580_v44, 5  ;;  %v2349_v37 = vld [vmem:[%s3012_s10 + $0x44] sm:$0xf] }
  0x4b   : > { %2614 = vmatpush3.bf16.msra.mxu1 %v2902_v62  ;;  %v521_v56 = vor.u32 %v520_v48, %v517_v47  ;;  %v2303_v60 = vcombine.low %v1234_v51, %v1248_v55  ;;  %v540_v62 = vrot.slane %v538_v49, 5  ;;  %v536_v7 = vrot.slane %v535_v61, 4  ;;  %v2317_v51 = vld [vmem:[%s3012_s10 + $0xc0] sm:$0xf]  ;;  %v508_v61 = vld [vmem:[%s3012_s10 + $0xc8] sm:$0x1] }
  0x4c   : > { %2710 = vmatpush3.bf16.msra.mxu0 %v2903_v10  ;;  %2615 = vmatprep.subr.bf16.mxu1 %v2904_v16  ;;  %v557_v10 = vshrl.u32 %v501_v4, 16  ;;  %v554_v27 = vrot.slane %v552_v18, 5  ;;  %v2337_v47 = vcombine.low %v3208_v33, %v2315_v34  ;;  %v588_v48 = vshll.u32 %v505_v39, 16  ;;  %v2922_v33 = vld [vmem:[%s3367_s1 + $0xd8] sm:$0xff]   ;;  %v2925_v43 = vld [vmem:[%s3367_s1 + $0x1e0] sm:$0xff]   ;;  %v2926_v44 = vld [vmem:[%s3367_s1 + $0xe8] sm:$0xff]  }
  0x4d   : > { %2711 = vmatprep.subr.bf16.mxu0 %v2905_v25  ;;  %v522_v1 = vrot.slane %v521_v56, 4  ;;  %v594_v49 = vshll.u32 %v506_v41, 16  ;;  %v573_v52 = vrot.slane %v571_v42, 4  ;;  %v587_v55 = vrot.slane %v585_v45, 4  ;;  %v507_v56 = vld [vmem:[%s3012_s10 + $0xc0] sm:$0xf] }
  0x4e   : > { %2608 = vmatmul.mubr.bf16.gmra.mrb[4].mxu1 %v2159_v31  ;;  %v559_v19 = vrot.slane %v557_v10, 4  ;;  %v2914_v31 = vld [vmem:[%s3367_s1 + $0xb8] sm:$0xff]   ;;  %v590_v58 = vrot.slane %v588_v48, 5  ;;  %v602_v2 = vshll.u32 %v507_v56, 16  ;;  %v608_v4 = vshll.u32 %v508_v61, 16  ;;  %v2924_v42 = vld [vmem:[%s3367_s1 + $0xe0] sm:$0xff]  }
  0x4f   : > { %2616 = vmatpush3.bf16.msra.mxu1 %v2904_v16  ;;  %2704 = vmatmul.mubr.bf16.gmra.mrb[4].mxu0 %v2303_v60  ;;  %v527_v12 = vsel %vm3086_vm2, %v522_v1, %v526_v57  ;;  %v541_v16 = vsel %vm3086_vm2, %v536_v7, %v540_v62  ;;  %v509_v62 = vld [vmem:[%s3012_s10 + $0xe0] sm:$0xf]  ;;  %v599_v1 = vshrl.u32 %v507_v56, 16  ;;  %v624_v18 = vrot.slane %v622_v9, 5  ;;  %v2923_v39 = vld [vmem:[%s3367_s1 + $0x1d8] sm:$0xff]   ;;  %v2927_v45 = vld [vmem:[%s3367_s1 + $0x1e8] sm:$0xff]  }
  0x50   : > { %2712 = vmatpush3.bf16.msra.mxu0 %v2905_v25  ;;  %2617 = vmatprep.subr.bf16.mxu1 %v2906_v35  ;;  %v2184_v20 = vcombine.low %v527_v12, %v541_v16  ;;  %v563_v25 = vor.u32 %v562_v21, %v559_v19  ;;  %v613_v7 = vshrl.u32 %v509_v62, 16  ;;  %v616_v8 = vshll.u32 %v509_v62, 16  ;;  %v2318_v21 = vld [vmem:[%s3012_s10 + $0xe0] sm:$0xf]  ;;  %v2928_v48 = vld [vmem:[%s3367_s1 + $0xf0] sm:$0xff]  }
  0x51   : > { %2713 = vmatprep.subr.bf16.mxu0 %v2907_v50  ;;  %2723 = vmatprep.mubr.bf16.mxu0 %v2336_v63  ;;  %v577_v63 = vor.u32 %v576_v53, %v573_v52  ;;  %v604_v12 = vrot.slane %v602_v2, 5  ;;  %v610_v13 = vrot.slane %v608_v4, 5  ;;  %v2385_v2 = vld [vmem:[%s3012_s10 + $0x28] sm:$0x1] }
  0x52   : > { %2627 = vmatprep.mubr.bf16.mxu1 %v2184_v20  ;;  %v564_v30 = vrot.slane %v563_v25, 4  ;;  %v615_v16 = vrot.slane %v613_v7, 4  ;;  %v618_v17 = vrot.slane %v616_v8, 5  ;;  %v2920_v25 = vld [vmem:[%s3367_s1 + $0xd0] sm:$0xff]   ;;  %v2387_v8 = vld [vmem:[%s3012_s10 + $0x48] sm:$0x1] }
  0x53   : > { %2618 = vmatpush3.bf16.msra.mxu1 %v2906_v35  ;;  %v555_v35 = vsel %vm3086_vm2, %v550_v29, %v554_v27  ;;  %v578_v10 = vrot.slane %v577_v63, 4  ;;  %v2199_v63 = vld [vmem:[%s3012_s10 + $0x70] sm:$0xf] }
  0x54   : > { %2714 = vmatpush3.bf16.msra.mxu0 %v2907_v50  ;;  %2619 = vmatprep.subr.bf16.mxu1 %v2908_v59  ;;  %v569_v36 = vsel %vm3086_vm2, %v564_v30, %v568_v28  ;;  %v2316_v50 = vld [vmem:[%s3012_s10 + $0xa0] sm:$0xf]  ;;  %v619_v23 = vor.u32 %v618_v17, %v615_v16  ;;  %v2921_v28 = vld [vmem:[%s3367_s1 + $0x1d0] sm:$0xff]  }
  0x55   : > { %2715 = vmatprep.subr.bf16.mxu0 %v2909_v6  ;;  %v2185_v57 = vcombine.low %v555_v35, %v569_v36  ;;  %v2338_v60 = vcombine.low %v2316_v50, %v2317_v51  ;;  %v583_v19 = vsel %vm3086_vm2, %v578_v10, %v582_v54  ;;  %v2348_v36 = vld [vmem:[%s3012_s10 + $0x24] sm:$0xf]  ;;  %v2929_v50 = vld [vmem:[%s3367_s1 + $0x1f0] sm:$0xff]   ;;  %v2394_v51 = vld [vmem:[%s3012_s10 + $0xc0] sm:$0xf] }
  0x56   : > { %v620_v29 = vrot.slane %v619_v23, 4  ;;  %v2372_v41 = vcombine.low %v2348_v36, %v2349_v37  ;;  %v1831_v61 = vshrl.u32 %v2394_v51, 16  ;;  %v1834_v62 = vshll.u32 %v2394_v51, 16 }
  0x57   : > { %2620 = vmatpush3.bf16.msra.mxu1 %v2908_v59  ;;  %v596_v59 = vrot.slane %v594_v49, 5  ;;  %v2392_v49 = vld [vmem:[%s3012_s10 + $0xa0] sm:$0xf]  ;;  %v1770_v23 = vshll.u32 %v2385_v2, 16 }
  0x58   : > { %2716 = vmatpush3.bf16.msra.mxu0 %v2909_v6  ;;  %2621 = vmatprep.subr.bf16.mxu1 %v2910_v11  ;;  %v591_v6 = vor.u32 %v590_v58, %v587_v55  ;;  %v625_v34 = vsel %vm3086_vm2, %v620_v29, %v624_v18  ;;  %v1817_v56 = vshrl.u32 %v2392_v49, 16  ;;  %v2930_v58 = vld [vmem:[%s3367_s1 + $0xf8] sm:$0xff]   ;;  %v2200_v18 = vld [vmem:[%s3012_s10 + $0x90] sm:$0xf] }
  0x59   : > { %2717 = vmatprep.subr.bf16.mxu0 %v2911_v15 }
  0x5a   : > { %v1819_v9 = vrot.slane %v1817_v56, 4  ;;  %v2388_v56 = vld [vmem:[%s3012_s10 + $0x60] sm:$0xf] }
  0x5b   : > { %2622 = vmatpush3.bf16.msra.mxu1 %v2910_v11  ;;  %v601_v11 = vrot.slane %v599_v1, 4  ;;  %v2351_v1 = vld [vmem:[%s3012_s10 + $0x84] sm:$0xf] }
  0x5c   : > { %2718 = vmatpush3.bf16.msra.mxu0 %v2911_v15  ;;  %2623 = vmatprep.subr.bf16.mxu1 %v2912_v24  ;;  %v592_v15 = vrot.slane %v591_v6, 4  ;;  %v2373_v17 = vcombine.low %v2350_v0, %v2351_v1  ;;  %v1789_v0 = vshrl.u32 %v2388_v56, 16  ;;  %v1792_v1 = vshll.u32 %v2388_v56, 16 }
  0x5d   : > { %2719 = vmatprep.subr.bf16.mxu0 %v2913_v26  ;;  %v605_v20 = vor.u32 %v604_v12, %v601_v11  ;;  %v1833_v11 = vrot.slane %v1831_v61, 4  ;;  %v1836_v12 = vrot.slane %v1834_v62, 5 }
  0x5e   : > { %v597_v22 = vsel %vm3086_vm2, %v592_v15, %v596_v59  ;;  %v2931_v59 = vld [vmem:[%s3367_s1 + $0x1f8] sm:$0xff]   ;;  %v2395_v15 = vld [vmem:[%s3012_s10 + $0xc8] sm:$0x1] }
  0x5f   : > { %2624 = vmatpush3.bf16.msra.mxu1 %v2912_v24  ;;  %v2319_v24 = vld [vmem:[%s3012_s10 + $0x100] sm:$0xf]  ;;  %v606_v27 = vrot.slane %v605_v20, 4  ;;  %v2352_v20 = vld [vmem:[%s3012_s10 + $0xa4] sm:$0xf]  ;;  %v1840_v29 = vshll.u32 %v2395_v15, 16 }
  0x60   : > { %2720 = vmatpush3.bf16.msra.mxu0 %v2913_v26  ;;  %2625 = vmatprep.subr.bf16.mxu1 %v2914_v31  ;;  %v2186_v26 = vcombine.low %v583_v19, %v597_v22  ;;  %v2339_v35 = vcombine.low %v2318_v21, %v2319_v24  ;;  %v2201_v19 = vld [vmem:[%s3012_s10 + $0xb0] sm:$0xf]  ;;  %v2353_v21 = vld [vmem:[%s3012_s10 + $0xc4] sm:$0xf]  ;;  %v2399_v15 = vld [vmem:[%s3012_s10 + $0x108] sm:$0x1] }
  0x61   : > { %2721 = vmatprep.subr.bf16.mxu0 %v2915_v32  ;;  %v611_v30 = vsel %vm3086_vm2, %v606_v27, %v610_v13  ;;  %v2932_v13 = vld [vmem:[%s3367_s1 + $0x200] sm:$0xff]  }
  0x62   : > { %v2187_v38 = vcombine.low %v611_v30, %v625_v34  ;;  %v2933_v30 = vld [vmem:[%s3367_s1 + $0x208] sm:$0xff]  }
  0x63   : > { %2626 = vmatpush3.bf16.msra.mxu1 %v2914_v31  ;;  %v2196_v31 = vld [vmem:[%s3012_s10 + $0x10] sm:$0xf] }
  0x64   : > { %2722 = vmatpush3.bf16.msra.mxu0 %v2915_v32  ;;  %2635 = vmatprep.subr.bf16.mxu1 %v2916_v40  ;;  %v2197_v32 = vld [vmem:[%s3012_s10 + $0x30] sm:$0xf] }
  0x65   : > { %2731 = vmatprep.subr.bf16.mxu0 %v2917_v46 }
  0x66   : > { %2628 = vmatmul.mubr.bf16.vlgmr.msra.gmra.mrb[0].mxu1 %v2185_v57  ;;  %v1820_v57 = vshll.u32 %v2392_v49, 16 }
  0x67   : > { %2636 = vmatpush3.bf16.msra.mxu1 %v2916_v40  ;;  %2724 = vmatmul.mubr.bf16.vlgmr.msra.gmra.mrb[0].mxu0 %v2337_v47  ;;  %v2220_v40 = vcombine.low %v2196_v31, %v2197_v32  ;;  %v2386_v47 = vld [vmem:[%s3012_s10 + $0x40] sm:$0xf]  ;;  %v2222_v31 = vcombine.low %v2200_v18, %v2201_v19  ;;  %v2374_v32 = vcombine.low %v2352_v20, %v2353_v21  ;;  %v1868_v21 = vshll.u32 %v2399_v15, 16 }
  0x68   : > { %2732 = vmatpush3.bf16.msra.mxu0 %v2917_v46  ;;  %2637 = vmatprep.subr.bf16.mxu1 %v2918_v5  ;;  %v2384_v46 = vld [vmem:[%s3012_s10 + $0x20] sm:$0xf]  ;;  %v1775_v54 = vshrl.u32 %v2386_v47, 16  ;;  %v1778_v55 = vshll.u32 %v2386_v47, 16  ;;  %v1822_v10 = vrot.slane %v1820_v57, 5 }
  0x69   : > { %2733 = vmatprep.subr.bf16.mxu0 %v2919_v14  ;;  %2727 = vmatprep.mubr.bf16.mxu0 %v2338_v60  ;;  %v1761_v52 = vshrl.u32 %v2384_v46, 16  ;;  %v1764_v53 = vshll.u32 %v2384_v46, 16  ;;  %v2198_v60 = vld [vmem:[%s3012_s10 + $0x50] sm:$0xf]  ;;  %v2390_v57 = vld [vmem:[%s3012_s10 + $0x80] sm:$0xf] }
  0x6a   : > { %2631 = vmatprep.mubr.bf16.mxu1 %v2186_v26  ;;  %v1777_v6 = vrot.slane %v1775_v54, 4  ;;  %v1780_v7 = vrot.slane %v1778_v55, 5  ;;  %v2221_v16 = vcombine.low %v2198_v60, %v2199_v63  ;;  %v1823_v26 = vor.u32 %v1822_v10, %v1819_v9  ;;  %v2398_v54 = vld [vmem:[%s3012_s10 + $0x100] sm:$0xf] }
  0x6b   : > { %2638 = vmatpush3.bf16.msra.mxu1 %v2918_v5  ;;  %v1763_v4 = vrot.slane %v1761_v52, 4  ;;  %v1766_v5 = vrot.slane %v1764_v53, 5  ;;  %v2935_v52 = vld [vmem:[%s3367_s1 + $0x218] sm:$0xff]   ;;  %v2396_v53 = vld [vmem:[%s3012_s10 + $0xe0] sm:$0xf]  ;;  %v1859_v61 = vshrl.u32 %v2398_v54, 16 }
  0x6c   : > { %2734 = vmatpush3.bf16.msra.mxu0 %v2919_v14  ;;  %2639 = vmatprep.subr.bf16.mxu1 %v2920_v25  ;;  %v2393_v14 = vld [vmem:[%s3012_s10 + $0xa8] sm:$0x1]  ;;  %v1781_v24 = vor.u32 %v1780_v7, %v1777_v6  ;;  %v1848_v60 = vshll.u32 %v2396_v53, 16  ;;  %v1862_v62 = vshll.u32 %v2398_v54, 16  ;;  %v2936_v63 = vld [vmem:[%s3367_s1 + $0x220] sm:$0xff]   ;;  %v1803_v2 = vshrl.u32 %v2390_v57, 16 }
  0x6d   : > { %2735 = vmatprep.subr.bf16.mxu0 %v2921_v28  ;;  %v1767_v22 = vor.u32 %v1766_v5, %v1763_v4  ;;  %v1826_v27 = vshll.u32 %v2393_v14, 16  ;;  %v1806_v4 = vshll.u32 %v2390_v57, 16  ;;  %v2937_v5 = vld [vmem:[%s3367_s1 + $0x228] sm:$0xff]   ;;  %v1861_v9 = vrot.slane %v1859_v61, 4  ;;  %v2428_v57 = vld [vmem:[%s3368_s2] ss:$0 sm:$0xff] }
  0x6e   : > { %2632 = vmatmul.mubr.bf16.gmra.mrb[4].mxu1 %v2187_v38  ;;  %v1782_v36 = vrot.slane %v1781_v24, 4  ;;  %v2203_v38 = vld [vmem:[%s3012_s10 + $0xf0] sm:$0xf]  ;;  %v2397_v6 = vld [vmem:[%s3012_s10 + $0xe8] sm:$0x1]  ;;  %v1864_v10 = vrot.slane %v1862_v62, 5 }
  0x6f   : > { %2640 = vmatpush3.bf16.msra.mxu1 %v2920_v25  ;;  %2728 = vmatmul.mubr.bf16.gmra.mrb[4].mxu0 %v2339_v35  ;;  %v1784_v25 = vshll.u32 %v2387_v8, 16  ;;  %v1768_v34 = vrot.slane %v1767_v22, 4  ;;  %v1772_v35 = vrot.slane %v1770_v23, 5  ;;  %v1850_v8 = vrot.slane %v1848_v60, 5  ;;  %v2938_v22 = vld [vmem:[%s3367_s1 + $0x230] sm:$0xff]  }
  0x70   : > { %2736 = vmatpush3.bf16.msra.mxu0 %v2921_v28  ;;  %2641 = vmatprep.subr.bf16.mxu1 %v2922_v33  ;;  %v1837_v28 = vor.u32 %v1836_v12, %v1833_v11  ;;  %v1791_v11 = vrot.slane %v1789_v0, 4  ;;  %v1794_v12 = vrot.slane %v1792_v1, 5  ;;  %v1808_v14 = vrot.slane %v1806_v4, 5 }
  0x71   : > { %2737 = vmatprep.subr.bf16.mxu0 %v2923_v39  ;;  %2651 = vmatprep.mubr.bf16.mxu1 %v2220_v40  ;;  %v1786_v37 = vrot.slane %v1784_v25, 5  ;;  %v1828_v40 = vrot.slane %v1826_v27, 5  ;;  %v1773_v47 = vsel %vm3086_vm2, %v1768_v34, %v1772_v35  ;;  %v1854_v19 = vshll.u32 %v2397_v6, 16 }
  0x72   : > { %2747 = vmatprep.mubr.bf16.mxu0 %v2372_v41  ;;  %v1838_v41 = vrot.slane %v1837_v28, 4  ;;  %v1865_v20 = vor.u32 %v1864_v10, %v1861_v9  ;;  %v1795_v23 = vor.u32 %v1794_v12, %v1791_v11 }
  0x73   : > { %2642 = vmatpush3.bf16.msra.mxu1 %v2922_v33  ;;  %v2202_v33 = vld [vmem:[%s3012_s10 + $0xd0] sm:$0xf]  ;;  %v1856_v28 = vrot.slane %v1854_v19, 5 }
  0x74   : > { %2738 = vmatpush3.bf16.msra.mxu0 %v2923_v39  ;;  %2643 = vmatprep.subr.bf16.mxu1 %v2924_v42  ;;  %v1824_v39 = vrot.slane %v1823_v26, 4  ;;  %v2223_v46 = vcombine.low %v2202_v33, %v2203_v38 }
  0x75   : > { %2739 = vmatprep.subr.bf16.mxu0 %v2925_v43 }
  0x77   : > { %2644 = vmatpush3.bf16.msra.mxu1 %v2924_v42  ;;  %v1842_v42 = vrot.slane %v1840_v29, 5  ;;  %v1866_v29 = vrot.slane %v1865_v20, 4 }
  0x78   : > { %2740 = vmatpush3.bf16.msra.mxu0 %v2925_v43  ;;  %2645 = vmatprep.subr.bf16.mxu1 %v2926_v44  ;;  %v2354_v43 = vld [vmem:[%s3012_s10 + $0xe4] sm:$0xf] }
  0x79   : > { %2741 = vmatprep.subr.bf16.mxu0 %v2927_v45  ;;  %v1843_v51 = vsel %vm3086_vm2, %v1838_v41, %v1842_v42 }
  0x7b   : > { %2646 = vmatpush3.bf16.msra.mxu1 %v2926_v44  ;;  %v2355_v44 = vld [vmem:[%s3012_s10 + $0x104] sm:$0xf] }
  0x7c   : > { %2742 = vmatpush3.bf16.msra.mxu0 %v2927_v45  ;;  %2647 = vmatprep.subr.bf16.mxu1 %v2928_v48  ;;  %v2934_v45 = vld [vmem:[%s3367_s1 + $0x210] sm:$0xff]   ;;  %v2375_v49 = vcombine.low %v2354_v43, %v2355_v44 }
  0x7d   : > { %2743 = vmatprep.subr.bf16.mxu0 %v2929_v50 }
  0x7f   : > { %2648 = vmatpush3.bf16.msra.mxu1 %v2928_v48  ;;  %v1787_v48 = vsel %vm3086_vm2, %v1782_v36, %v1786_v37 }
  0x80   : > { %2744 = vmatpush3.bf16.msra.mxu0 %v2929_v50  ;;  %2649 = vmatprep.subr.bf16.mxu1 %v2930_v58  ;;  %v1829_v50 = vsel %vm3086_vm2, %v1824_v39, %v1828_v40  ;;  %v2416_v55 = vcombine.low %v1773_v47, %v1787_v48 }
  0x81   : > { %2745 = vmatprep.subr.bf16.mxu0 %v2931_v59 }
  0x83   : > { %2650 = vmatpush3.bf16.msra.mxu1 %v2930_v58  ;;  %v2418_v58 = vcombine.low %v1829_v50, %v1843_v51 }
  0x84   : > { %2746 = vmatpush3.bf16.msra.mxu0 %v2931_v59  ;;  %2779 = vmatprep.subr.bf16.mxu1 %v2932_v13  ;;  %v1845_v59 = vshrl.u32 %v2396_v53, 16 }
  0x85   : > { %2755 = vmatprep.subr.bf16.mxu0 %v2932_v13 }
  0x86   : > { %2652 = vmatmul.mubr.bf16.vlgmr.msra.gmra.mrb[0].mxu1 %v2221_v16  ;;  %v1847_v7 = vrot.slane %v1845_v59, 4  ;;  %v2389_v16 = vld [vmem:[%s3012_s10 + $0x68] sm:$0x1] }
  0x87   : > { %2748 = vmatmul.mubr.bf16.vlgmr.msra.gmra.mrb[0].mxu0 %v2373_v17  ;;  %2787 = vmatpush3.bf16.msra.mxu1 %v2932_v13  ;;  %v2391_v17 = vld [vmem:[%s3012_s10 + $0x88] sm:$0x1]  ;;  %v1798_v24 = vshll.u32 %v2389_v16, 16 }
  0x88   : > { %2756 = vmatpush3.bf16.msra.mxu0 %v2932_v13  ;;  %2780 = vmatprep.subr.bf16.mxu1 %v2933_v30  ;;  %v1805_v13 = vrot.slane %v1803_v2, 4  ;;  %v1851_v18 = vor.u32 %v1850_v8, %v1847_v7  ;;  %v1812_v26 = vshll.u32 %v2391_v17, 16 }
  0x89   : > { %2757 = vmatprep.subr.bf16.mxu0 %v2933_v30  ;;  %2655 = vmatprep.mubr.bf16.mxu1 %v2222_v31  ;;  %v2939_v31 = vld [vmem:[%s3367_s1 + $0x238] sm:$0xff]   ;;  %v1800_v33 = vrot.slane %v1798_v24, 5 }
  0x8a   : > { %2751 = vmatprep.mubr.bf16.mxu0 %v2374_v32  ;;  %v1809_v25 = vor.u32 %v1808_v14, %v1805_v13  ;;  %v1852_v27 = vrot.slane %v1851_v18, 4  ;;  %v1796_v32 = vrot.slane %v1795_v23, 4  ;;  %v1814_v35 = vrot.slane %v1812_v26, 5 }
  0x8b   : > { %2788 = vmatpush3.bf16.msra.mxu1 %v2933_v30 }
  0x8c   : > { %2758 = vmatpush3.bf16.msra.mxu0 %v2933_v30  ;;  %2781 = vmatprep.subr.bf16.mxu1 %v2934_v45  ;;  %v1870_v30 = vrot.slane %v1868_v21, 5  ;;  %v1810_v34 = vrot.slane %v1809_v25, 4  ;;  %v1857_v36 = vsel %vm3086_vm2, %v1852_v27, %v1856_v28  ;;  %v1801_v38 = vsel %vm3086_vm2, %v1796_v32, %v1800_v33 }
  0x8d   : > { %2759 = vmatprep.subr.bf16.mxu0 %v2934_v45 }
  0x8e   : > { %2656 = vmatmul.mubr.bf16.gmra.mrb[4].mxu1 %v2223_v46  ;;  %v1871_v37 = vsel %vm3086_vm2, %v1866_v29, %v1870_v30  ;;  %v1815_v39 = vsel %vm3086_vm2, %v1810_v34, %v1814_v35 }
  0x8f   : > { %2752 = vmatmul.mubr.bf16.gmra.mrb[4].mxu0 %v2375_v49  ;;  %2789 = vmatpush3.bf16.msra.mxu1 %v2934_v45  ;;  %v2419_v40 = vcombine.low %v1857_v36, %v1871_v37  ;;  %v2417_v41 = vcombine.low %v1801_v38, %v1815_v39 }
  0x90   : > { %2760 = vmatpush3.bf16.msra.mxu0 %v2934_v45  ;;  %2782 = vmatprep.subr.bf16.mxu1 %v2935_v52 }
  0x91   : > { %2761 = vmatprep.subr.bf16.mxu0 %v2935_v52  ;;  %2771 = vmatprep.mubr.bf16.mxu0 %v2416_v55 }
  0x92   : > { %2775 = vmatprep.mubr.bf16.mxu1 %v2418_v58 }
  0x93   : > { %2790 = vmatpush3.bf16.msra.mxu1 %v2935_v52 }
  0x94   : > { %2762 = vmatpush3.bf16.msra.mxu0 %v2935_v52  ;;  %2783 = vmatprep.subr.bf16.mxu1 %v2936_v63 }
  0x95   : > { %2763 = vmatprep.subr.bf16.mxu0 %v2936_v63 }
  0x97   : > { %2791 = vmatpush3.bf16.msra.mxu1 %v2936_v63 }
  0x98   : > { %2764 = vmatpush3.bf16.msra.mxu0 %v2936_v63  ;;  %2784 = vmatprep.subr.bf16.mxu1 %v2937_v5 }
  0x99   : > { %2765 = vmatprep.subr.bf16.mxu0 %v2937_v5 }
  0x9b   : > { %2792 = vmatpush3.bf16.msra.mxu1 %v2937_v5 }
  0x9c   : > { %2766 = vmatpush3.bf16.msra.mxu0 %v2937_v5  ;;  %2785 = vmatprep.subr.bf16.mxu1 %v2938_v22 }
  0x9d   : > { %2767 = vmatprep.subr.bf16.mxu0 %v2938_v22 }
  0x9f   : > { %2793 = vmatpush3.bf16.msra.mxu1 %v2938_v22 }
  0xa0   : > { %2768 = vmatpush3.bf16.msra.mxu0 %v2938_v22  ;;  %2786 = vmatprep.subr.bf16.mxu1 %v2939_v31 }
  0xa1   : > { %2769 = vmatprep.subr.bf16.mxu0 %v2939_v31 }
  0xa3   : > { %2794 = vmatpush3.bf16.msra.mxu1 %v2939_v31 }
  0xa4   : > { %2770 = vmatpush3.bf16.msra.mxu0 %v2939_v31 }
  0xa6   : > { %2776 = vmatmul.mubr.bf16.vlgmr.msra.gmra.mrb[8].mxu1 %v2419_v40 }
  0xa7   : > { %2772 = vmatmul.mubr.bf16.vlgmr.msra.gmra.mrb[0].mxu0 %v2417_v41 }
 0x159   : > { %v2653_v42 = vpop.f32.mrb[0].mxu1 }
 0x15a   : > { %v912_v43 = vpop.f32.mrb[1].mxu1 }
 0x15b   : > { %v2654_v44 = vpop.f32.mrb[2].mxu1 }
 0x15c   : > { %v915_v45 = vpop.f32.mrb[3].mxu1 }
 0x161   : > { %v2657_v46 = vpop.f32.mrb[4].mxu1 }
 0x162   : > { %v2753_v47 = vpop.f32.mrb[4].mxu0  ;;  %v928_v48 = vpop.f32.mrb[5].mxu1 }
 0x163   : > { %v2799_v49 = vadd.f32 %v2753_v47, %v2657_v46  ;;  %v1721_v50 = vpop.f32.mrb[5].mxu0  ;;  %v2658_v51 = vpop.f32.mrb[6].mxu1 }
 0x164   : > { %v2801_v52 = vadd.f32 %v1721_v50, %v928_v48  ;;  %v2754_v3 = vpop.f32.mrb[6].mxu0  ;;  %v931_v53 = vpop.f32.mrb[7].mxu1 }
 0x165   : > { %v2803_v54 = vadd.f32 %v2754_v3, %v2658_v51  ;;  %v1724_v55 = vpop.f32.mrb[7].mxu0 }
 0x166   : > { %v2805_v56 = vadd.f32 %v1724_v55, %v931_v53 }
 0x179   : > { %v2777_v58 = vpop.f32.mrb[8].mxu1 }
 0x17a   : > { %v2773_v59 = vpop.f32.mrb[0].mxu0  ;;  %v2800_v60 = vadd.f32 %v2799_v49, %v2777_v58  ;;  %v2003_v61 = vpop.f32.mrb[9].mxu1 }
 0x17b   : > { %v2795_v62 = vadd.f32 %v2773_v59, %v2653_v42  ;;  %v1987_v63 = vpop.f32.mrb[1].mxu0  ;;  %v2802_v0 = vadd.f32 %v2801_v52, %v2003_v61  ;;  %v2778_v1 = vpop.f32.mrb[10].mxu1 }
 0x17c   : > { %v2039_v2 = vadd.f32 %v2800_v60, %v2428_v57  ;;  %v2796_v4 = vadd.f32 %v1987_v63, %v912_v43  ;;  %v2774_v5 = vpop.f32.mrb[2].mxu0  ;;  %v2804_v6 = vadd.f32 %v2803_v54, %v2778_v1  ;;  %v2006_v7 = vpop.f32.mrb[11].mxu1 }
 0x17d   : > { %v2035_v8 = vadd.f32 %v2795_v62, %v2428_v57  ;;  %v2037_v9 = vadd.f32 %v2802_v0, %v2428_v57  ;;  %v2797_v10 = vadd.f32 %v2774_v5, %v2654_v44  ;;  %v1990_v11 = vpop.f32.mrb[3].mxu0  ;;  %v2806_v12 = vadd.f32 %v2805_v56, %v2006_v7 }
 0x17e   : > { %v2033_v13 = vadd.f32 %v2796_v4, %v2428_v57  ;;  %v2040_v14 = vadd.f32 %v2804_v6, %v2428_v57  ;;  %v2798_v15 = vadd.f32 %v1990_v11, %v915_v45  ;;  %v2047_v18 = vmax.f32 %v2039_v2, 0.0 }
 0x17f   : > { %v2036_v16 = vadd.f32 %v2797_v10, %v2428_v57  ;;  %v2038_v17 = vadd.f32 %v2806_v12, %v2428_v57  ;;  %v2043_v21 = vmax.f32 %v2035_v8, 0.0  ;;  %v2045_v22 = vmax.f32 %v2037_v9, 0.0 }
 0x180   : > { %v2048_v19 = vmax.f32 %v2040_v14, 0.0  ;;  %v2034_v20 = vadd.f32 %v2798_v15, %v2428_v57  ;;  %v2041_v25 = vmax.f32 %v2033_v13, 0.0 }
 0x181   : > { %v2044_v23 = vmax.f32 %v2036_v16, 0.0  ;;  %v2046_v24 = vmax.f32 %v2038_v17, 0.0 }
 0x182   : > { %v2450_v26 = vpack.c.bf16 %v2048_v19, %v2047_v18  ;;  %v2042_v27 = vmax.f32 %v2034_v20, 0.0 }
 0x183   : > { %v2440_v28 = vpack.c.bf16 %v2044_v23, %v2043_v21  ;;  %v2445_v29 = vpack.c.bf16 %v2046_v24, %v2045_v22 }
 0x184   : > { %2454 = vst [vmem:[%s170_s21 + $0x18] sm:$0xff] %v2450_v26   ;;  %v2435_v30 = vpack.c.bf16 %v2042_v27, %v2041_v25 }
 0x185   : > { %2452 = vst [vmem:[%s170_s21 + $0x8] sm:$0xff] %v2440_v28   ;;  %2453 = vst [vmem:[%s170_s21 + $0x10] sm:$0xff] %v2445_v29  }
 0x186   : > { %2436 = vst [vmem:[%s170_s21] sm:$0xff] %v2435_v30  }
 0x187 PF: > { %s13_s12 = sadd.s32 1, %s2946_s12  }
 0x188   : > { %p10_p4 = scmp.ge.s32.totalorder %s13_s12, 4  }
 0x18a   :  { %12 = sbr.rel (!%p10_p4) target bundleno = 1 (0x1), region = 72 }

</bundles_post_ra>
